<compile_context>
chip_gen: v6e
topology: v6e:2x2x1
jax: 0.10.0
libtpu: 0.0.40
codegen_flags: <defaults>
</compile_context>

<pallas_src>
import functools

import jax
import jax.numpy as jnp
from jax.experimental import pallas as pl
from jax.experimental.pallas import tpu as pltpu

_VMEM_LIMIT = 48 * 1024 * 1024  # fits v5e/v6e (128 MiB) and v7x (64 MiB) VMEM


# ----------------------------------------------------------------------------
# tiling helpers
# ----------------------------------------------------------------------------
def _largest_divisor_tile(n, cap, mult):
    """Largest divisor of n that is <= cap and a multiple of `mult`, else n."""
    if n <= cap:
        return n
    best = None
    for d in range(mult, cap + 1, mult):
        if n % d == 0:
            best = d
    return best if best is not None else n


def _pool_row_tile(ho, cap=32):
    for d in range(min(cap, ho), 0, -1):
        if ho % d == 0:
            return d
    return ho


# ----------------------------------------------------------------------------
# 3x3, stride-1, pad-1 convolution (+ fused bias & ReLU).
#
# Layout trick: pad H by (1, 2) and W by (1, 1) and flatten (H, W).  Then the
# tap (kh, kw) of output row m (= h*(W+2) + w) is input row m + kh*(W+2) + kw,
# so the 9 taps are pure row offsets of the flattened slab.  Columns W, W+1 of
# every output row are garbage (row wrap) and are cropped afterwards.
# ----------------------------------------------------------------------------
def _conv3x3_kernel(xb_ref, w_ref, b_ref, o_ref, *, taps, apply_relu):
    # xb_ref: (1, 1, TM + halo, Cin) bf16   haloed row block of the padded slab
    # w_ref : (9, Cin, TC)           bf16   tap matrices for this Cout tile
    # b_ref : (1, TC)                f32
    # o_ref : (1, TM, TC)            bf16
    tm, tc = o_ref.shape[1], o_ref.shape[2]
    acc = jnp.broadcast_to(b_ref[...], (tm, tc))           # f32
    for t, off in enumerate(taps):
        lhs = xb_ref[0, 0, pl.ds(off, tm), :]               # static slice
        acc = acc + jnp.dot(lhs, w_ref[t], preferred_element_type=jnp.float32)
    if apply_relu:
        acc = jnp.maximum(acc, 0.0)
    o_ref[0] = acc.astype(o_ref.dtype)


def conv3x3(x, w9, b, *, relu=True):
    """x: (N,H,W,Cin) bf16 NHWC; w9: (9,Cin,Cout) bf16; b: (Cout,) f32."""
    N, H, W, Cin = x.shape
    Cout = w9.shape[-1]
    Wp = W + 2
    Mo = H * Wp                                   # output rows (2 garbage cols/row)
    TM = _largest_divisor_tile(Mo, cap=8192, mult=8)
    nb = Mo // TM
    halo = 2 * Wp + 2                             # extra rows needed by the 9 taps
    TC = Cout if Cout <= 128 else Cout // 2       # >=2 Cout blocks for late layers
    taps = tuple(kh * Wp + kw for kh in range(3) for kw in range(3))

    # Width/height padded slab, flattened over (H, W).
    xp = jnp.pad(x, ((0, 0), (1, 2), (1, 1), (0, 0))).reshape(N, (H + 3) * Wp, Cin)
    # Haloed, blocked view: block i holds rows [i*TM, i*TM + TM + halo).
    xb = jnp.stack([xp[:, i * TM:i * TM + TM + halo, :] for i in range(nb)], axis=1)

    kernel = functools.partial(_conv3x3_kernel, taps=taps, apply_relu=relu)
    y = pl.pallas_call(
        kernel,
        out_shape=jax.ShapeDtypeStruct((N, Mo, Cout), x.dtype),
        grid_spec=pltpu.PrefetchScalarGridSpec(
            num_scalar_prefetch=0,
            grid=(N, nb, Cout // TC),
            in_specs=[
                pl.BlockSpec((1, 1, TM + halo, Cin), lambda n, i, j: (n, i, 0, 0)),
                pl.BlockSpec((9, Cin, TC), lambda n, i, j: (0, 0, j)),
                pl.BlockSpec((1, TC), lambda n, i, j: (0, j)),
            ],
            out_specs=pl.BlockSpec((1, TM, TC), lambda n, i, j: (n, i, j)),
        ),
        compiler_params=pltpu.CompilerParams(
            dimension_semantics=("parallel", "parallel", "parallel"),
            vmem_limit_bytes=_VMEM_LIMIT),
    )(xb, w9, b.reshape(1, Cout).astype(jnp.float32))
    return y.reshape(N, H, Wp, Cout)[:, :, :W, :]


# ----------------------------------------------------------------------------
# First conv (Cin = 3): fold the 9 taps into the contraction dim (K = 27).
# ----------------------------------------------------------------------------
def _conv_c3_kernel(p_ref, w_ref, b_ref, o_ref, *, apply_relu):
    acc = jnp.dot(p_ref[...], w_ref[...],
                  preferred_element_type=jnp.float32) + b_ref[...]
    if apply_relu:
        acc = jnp.maximum(acc, 0.0)
    o_ref[...] = acc.astype(o_ref.dtype)


def conv3x3_c3(x, w27, b, *, relu=True):
    """x: (N,H,W,3) bf16; w27: (27, Cout) bf16; b: (Cout,) f32."""
    N, H, W, Cin = x.shape
    Cout = w27.shape[-1]
    xp = jnp.pad(x, ((0, 0), (1, 1), (1, 1), (0, 0)))
    parts = [xp[:, kh:kh + H, kw:kw + W, :] for kh in range(3) for kw in range(3)]
    p = jnp.concatenate(parts, axis=-1).reshape(N * H * W, 9 * Cin)
    M = N * H * W
    TM = _largest_divisor_tile(M, cap=8192, mult=8)
    out = pl.pallas_call(
        functools.partial(_conv_c3_kernel, apply_relu=relu),
        out_shape=jax.ShapeDtypeStruct((M, Cout), x.dtype),
        grid_spec=pltpu.PrefetchScalarGridSpec(
            num_scalar_prefetch=0,
            grid=(M // TM,),
            in_specs=[
                pl.BlockSpec((TM, 9 * Cin), lambda i: (i, 0)),
                pl.BlockSpec((9 * Cin, Cout), lambda i: (0, 0)),
                pl.BlockSpec((1, Cout), lambda i: (0, 0)),
            ],
            out_specs=pl.BlockSpec((TM, Cout), lambda i: (i, 0)),
        ),
        compiler_params=pltpu.CompilerParams(
            dimension_semantics=("parallel",),
            vmem_limit_bytes=_VMEM_LIMIT),
    )(p, w27, b.reshape(1, Cout).astype(jnp.float32))
    return out.reshape(N, H, W, Cout)


# ----------------------------------------------------------------------------
# Fused 2x2, stride-2 max pool.  (W, C) is reshaped (for free, contiguous) to
# (Wo, 2C) so the column pair sits in the lane dim; the row pair is a leading
# dim of the block.  No strided HBM copies.
# ----------------------------------------------------------------------------
def _maxpool2x2_kernel(x_ref, o_ref, *, c):
    v = x_ref[0]                                      # (THo, 2, Wo, 2C)
    rm = jnp.maximum(v[:, 0], v[:, 1])                # row-pair max  -> (THo, Wo, 2C)
    o_ref[0] = jnp.maximum(rm[:, :, :c], rm[:, :, c:])  # column-pair max


def maxpool2x2(x):
    N, H, W, C = x.shape
    Ho, Wo = H // 2, W // 2
    xr = x.reshape(N, Ho, 2, Wo, 2 * C)               # contiguous => free reshape
    THo = _pool_row_tile(Ho)
    return pl.pallas_call(
        functools.partial(_maxpool2x2_kernel, c=C),
        out_shape=jax.ShapeDtypeStruct((N, Ho, Wo, C), x.dtype),
        grid=(N, Ho // THo),
        in_specs=[pl.BlockSpec((1, THo, 2, Wo, 2 * C),
                               lambda n, i: (n, i, 0, 0, 0))],
        out_specs=pl.BlockSpec((1, THo, Wo, C), lambda n, i: (n, i, 0, 0)),
        compiler_params=pltpu.CompilerParams(
            dimension_semantics=("parallel", "parallel"),
            vmem_limit_bytes=_VMEM_LIMIT),
    )(xr)


# ----------------------------------------------------------------------------
# Fully connected layer: y = x @ W^T + b, weights kept in the PyTorch (Nout, K)
# layout (no HBM transpose), contraction on dim 1 of both operands.
# ----------------------------------------------------------------------------
def _fc_kernel(x_ref, w_ref, b_ref, o_ref, acc_ref, *, apply_relu):
    k = pl.program_id(1)

    @pl.when(k == 0)
    def _():
        acc_ref[...] = jnp.broadcast_to(b_ref[...], acc_ref.shape)

    acc_ref[...] += jax.lax.dot_general(
        x_ref[...], w_ref[...],
        dimension_numbers=(((1,), (1,)), ((), ())),
        preferred_element_type=jnp.float32)

    @pl.when(k == pl.num_programs(1) - 1)
    def _():
        out = acc_ref[...]
        if apply_relu:
            out = jnp.maximum(out, 0.0)
        o_ref[...] = out.astype(o_ref.dtype)


def linear(x, w, b, *, relu=False):
    """x: (B, K) bf16; w: (Nout, K) bf16 (PyTorch layout); b: (Nout,) f32."""
    B, K = x.shape
    Nout = w.shape[0]
    TN = _largest_divisor_tile(Nout, cap=1024, mult=128)
    TK = _largest_divisor_tile(K, cap=3584, mult=128)
    return pl.pallas_call(
        functools.partial(_fc_kernel, apply_relu=relu),
        out_shape=jax.ShapeDtypeStruct((B, Nout), x.dtype),
        grid_spec=pltpu.PrefetchScalarGridSpec(
            num_scalar_prefetch=0,
            grid=(Nout // TN, K // TK),
            in_specs=[
                pl.BlockSpec((B, TK), lambda j, k: (0, k)),
                pl.BlockSpec((TN, TK), lambda j, k: (j, k)),
                pl.BlockSpec((1, TN), lambda j, k: (0, j)),
            ],
            out_specs=pl.BlockSpec((B, TN), lambda j, k: (0, j)),
            scratch_shapes=[pltpu.VMEM((B, TN), jnp.float32)],
        ),
        compiler_params=pltpu.CompilerParams(
            dimension_semantics=("parallel", "arbitrary"),
            vmem_limit_bytes=_VMEM_LIMIT),
    )(x, w, b.reshape(1, Nout).astype(jnp.float32))


# ----------------------------------------------------------------------------
# Parameters (deterministic He-style init; synthetic, not a checkpoint load).
# ----------------------------------------------------------------------------
_CONV_SHAPES = [(64, 3), (64, 64),
                (128, 64), (128, 128),
                (256, 128), (256, 256), (256, 256),
                (512, 256), (512, 512), (512, 512),
                (512, 512), (512, 512), (512, 512)]
_FC_SHAPES = [(4096, 512 * 7 * 7), (4096, 4096), (2622, 4096)]
_BLOCK_SIZES = [2, 2, 3, 3, 3]


def init_params(key):
    """PyTorch-layout f32 parameters (mirrors the nn.Module's tensors)."""
    params = {}
    keys = jax.random.split(key, 2 * (len(_CONV_SHAPES) + len(_FC_SHAPES)))
    ki = iter(range(len(keys)))
    for i, (cout, cin) in enumerate(_CONV_SHAPES):
        std = (2.0 / (cin * 9)) ** 0.5
        params[f"conv{i}_w"] = std * jax.random.normal(
            keys[next(ki)], (cout, cin, 3, 3), jnp.float32)
        params[f"conv{i}_b"] = 0.05 * jax.random.normal(
            keys[next(ki)], (cout,), jnp.float32)
    for j, (nout, nin) in enumerate(_FC_SHAPES):
        std = (2.0 / nin) ** 0.5
        params[f"fc{j}_w"] = std * jax.random.normal(
            keys[next(ki)], (nout, nin), jnp.float32)
        params[f"fc{j}_b"] = 0.05 * jax.random.normal(
            keys[next(ki)], (nout,), jnp.float32)
    return params


def conv_w_to_taps(w):
    """(Cout, Cin, 3, 3) -> (9, Cin, Cout) bf16 tap matrices."""
    cout, cin = w.shape[0], w.shape[1]
    return jnp.transpose(w, (2, 3, 1, 0)).reshape(9, cin, cout).astype(jnp.bfloat16)


def prepare_params(params):
    """One-time conversion of PyTorch-layout f32 params to kernel layouts."""
    p = {}
    w0 = params["conv0_w"]
    p["conv0_w"] = jnp.transpose(w0, (2, 3, 1, 0)).reshape(
        27, w0.shape[0]).astype(jnp.bfloat16)
    p["conv0_b"] = params["conv0_b"].astype(jnp.float32)
    for i in range(1, len(_CONV_SHAPES)):
        p[f"conv{i}_w"] = conv_w_to_taps(params[f"conv{i}_w"])
        p[f"conv{i}_b"] = params[f"conv{i}_b"].astype(jnp.float32)
    for j in range(len(_FC_SHAPES)):
        p[f"fc{j}_w"] = params[f"fc{j}_w"].astype(jnp.bfloat16)   # keep (Nout, K)
        p[f"fc{j}_b"] = params[f"fc{j}_b"].astype(jnp.float32)
    return p


# ----------------------------------------------------------------------------
# VGG_FACE forward.  Returns the same `result` list as the PyTorch module:
# the post-ReLU activation of the first conv of each of the 5 blocks (NCHW).
# ----------------------------------------------------------------------------
def vgg_face_forward(params, x_nchw, *, with_logits=False):
    x = jnp.transpose(x_nchw, (0, 2, 3, 1)).astype(jnp.bfloat16)   # NCHW -> NHWC
    result = []
    idx = 0
    for nblk in _BLOCK_SIZES:
        for s in range(nblk):
            if idx == 0:
                x = conv3x3_c3(x, params["conv0_w"], params["conv0_b"], relu=True)
            else:
                x = conv3x3(x, params[f"conv{idx}_w"], params[f"conv{idx}_b"],
                            relu=True)
            if s == 0:
                result.append(jnp.transpose(x, (0, 3, 1, 2)).astype(jnp.float32))
            idx += 1
        x = maxpool2x2(x)

    # Classifier head (its output is discarded by the PyTorch forward; request
    # with_logits=True to keep it alive instead of being dead-code-eliminated).
    n = x.shape[0]
    flat = jnp.transpose(x, (0, 3, 1, 2)).reshape(n, -1)   # C,H,W flatten order
    h = linear(flat, params["fc0_w"], params["fc0_b"], relu=True)
    # TODO(synk): nn.Dropout(0.5) is identity at inference; skipped.
    h = linear(h, params["fc1_w"], params["fc1_b"], relu=True)
    logits = linear(h, params["fc2_w"], params["fc2_b"], relu=False)
    if with_logits:
        return result, logits.astype(jnp.float32)
    return result


if __name__ == "__main__":
    key = jax.random.PRNGKey(0)
    pkey, xkey, tkey = jax.random.split(key, 3)
    k1, k2, k3, k4, k5, k6 = jax.random.split(tkey, 6)

    # ---- small isolated kernel checks (bf16 inputs, loose tolerances) ------
    # conv3x3 (flattened-slab wrap trick) vs XLA conv on bf16-rounded inputs.
    xc = jax.random.normal(k1, (1, 16, 16, 64), jnp.float32)
    wc = 0.06 * jax.random.normal(k2, (128, 64, 3, 3), jnp.float32)
    bc = 0.05 * jax.random.normal(k3, (128,), jnp.float32)
    got = conv3x3(xc.astype(jnp.bfloat16), conv_w_to_taps(wc), bc, relu=True)
    xc32 = xc.astype(jnp.bfloat16).astype(jnp.float32)
    wc32 = wc.astype(jnp.bfloat16).astype(jnp.float32)
    refc = jax.lax.conv_general_dilated(
        jnp.transpose(xc32, (0, 3, 1, 2)), wc32, (1, 1), "SAME",
        dimension_numbers=("NCHW", "OIHW", "NCHW"))
    refc = jnp.maximum(refc + bc[None, :, None, None], 0.0)
    refc = jnp.transpose(refc, (0, 2, 3, 1))
    assert jnp.allclose(got.astype(jnp.float32), refc, rtol=1e-2, atol=1e-2)

    # fused maxpool vs jnp reference (exact).
    xpool = jax.random.normal(k4, (1, 8, 8, 64), jnp.bfloat16)
    gp = maxpool2x2(xpool)
    rp = jnp.max(xpool.reshape(1, 4, 2, 4, 2, 64), axis=(2, 4))
    assert bool(jnp.all(gp == rp))

    # linear (PyTorch (Nout, K) layout, no transpose) vs jnp reference.
    xf = jax.random.normal(k5, (2, 256), jnp.float32)
    wf = 0.05 * jax.random.normal(k6, (384, 256), jnp.float32)
    bf = jnp.linspace(-0.1, 0.1, 384, dtype=jnp.float32)
    gl = linear(xf.astype(jnp.bfloat16), wf.astype(jnp.bfloat16), bf, relu=True)
    rl = jnp.maximum(
        xf.astype(jnp.bfloat16).astype(jnp.float32)
        @ wf.astype(jnp.bfloat16).astype(jnp.float32).T + bf, 0.0)
    assert jnp.allclose(gl.astype(jnp.float32), rl, rtol=1e-2, atol=1e-2)

    # ---- full forward -------------------------------------------------------
    raw = init_params(pkey)
    params = prepare_params(raw)
    # fc6 expects 512*7*7 features, so the module implies 3x224x224 inputs.
    x = jax.random.normal(xkey, (1, 3, 224, 224), jnp.float32)

    fwd = jax.jit(functools.partial(vgg_face_forward, with_logits=True))
    result, logits = fwd(params, x)
    (result, logits) = jax.block_until_ready((result, logits))

    expected_shapes = [(1, 64, 224, 224), (1, 128, 112, 112), (1, 256, 56, 56),
                       (1, 512, 28, 28), (1, 512, 14, 14)]
    assert [tuple(r.shape) for r in result] == expected_shapes
    assert logits.shape == (1, 2622)
    assert bool(jnp.all(jnp.isfinite(logits)))

    # conv1_1 output vs an XLA conv reference on bf16-rounded inputs.
    xb32 = x.astype(jnp.bfloat16).astype(jnp.float32)
    wb32 = raw["conv0_w"].astype(jnp.bfloat16).astype(jnp.float32)
    ref0 = jax.lax.conv_general_dilated(
        xb32, wb32, (1, 1), "SAME",
        dimension_numbers=("NCHW", "OIHW", "NCHW"))
    ref0 = jnp.maximum(ref0 + raw["conv0_b"][None, :, None, None], 0.0)
    assert jnp.allclose(result[0], ref0, rtol=2e-2, atol=2e-2)

    print("KERNEL_OK")
</pallas_src>

<mosaic_0001>
module attributes {stable_mosaic.version = 11 : i64} {
  func.func @_conv3x3_kernel(%arg0: i32, %arg1: i32, %arg2: i32, %arg3: memref<1x1x326x64xbf16, #tpu.memory_space<vmem>>, %arg4: memref<9x64x128xbf16, #tpu.memory_space<vmem>>, %arg5: memref<1x128xf32, #tpu.memory_space<vmem>>, %arg6: memref<1x288x128xbf16, #tpu.memory_space<vmem>>) attributes {dimension_semantics = [#tpu.dimension_semantics<parallel>, #tpu.dimension_semantics<parallel>, #tpu.dimension_semantics<parallel>], iteration_bounds = array<i64: 1, 1, 1>, scalar_prefetch = 0 : i64, scratch_operands = 0 : i64, tpu.core_type = #tpu.core_type<tc>, window_params = [{transform_indices = @transform_0, window_bounds = array<i64: 1, 1, 326, 64>}, {transform_indices = @transform_1, window_bounds = array<i64: 9, 64, 128>}, {transform_indices = @transform_2, window_bounds = array<i64: 1, 128>}, {transform_indices = @transform_3, window_bounds = array<i64: 1, 288, 128>}]} {
    %c0 = arith.constant 0 : index
    %c0_0 = arith.constant 0 : index
    %0 = vector.load %arg5[%c0, %c0_0] : memref<1x128xf32, #tpu.memory_space<vmem>>, vector<1x128xf32>
    %1 = vector.shape_cast %0 : vector<1x128xf32> to vector<1x128xf32>
    %2 = vector.broadcast %1 : vector<1x128xf32> to vector<288x128xf32>
    %c0_1 = arith.constant 0 : index
    %c0_2 = arith.constant 0 : index
    %c0_3 = arith.constant 0 : index
    %c0_4 = arith.constant 0 : index
    %3 = vector.load %arg3[%c0_1, %c0_2, %c0_3, %c0_4] : memref<1x1x326x64xbf16, #tpu.memory_space<vmem>>, vector<1x1x288x64xbf16>
    %4 = vector.shape_cast %3 : vector<1x1x288x64xbf16> to vector<288x64xbf16>
    %c0_5 = arith.constant 0 : index
    %c0_6 = arith.constant 0 : index
    %c0_7 = arith.constant 0 : index
    %5 = vector.load %arg4[%c0_5, %c0_6, %c0_7] : memref<9x64x128xbf16, #tpu.memory_space<vmem>>, vector<1x64x128xbf16>
    %6 = vector.shape_cast %5 : vector<1x64x128xbf16> to vector<64x128xbf16>
    %cst = arith.constant dense<0.000000e+00> : vector<288x128xf32>
    %7 = tpu.matmul %4, %6, %cst {dimension_numbers = #tpu.dot_dimension_numbers<[1], [0], [0], [1], [0, 0, 1, 1], [], []>} : vector<288x64xbf16>, vector<64x128xbf16>, vector<288x128xf32> -> vector<288x128xf32>
    %8 = arith.addf %2, %7 : vector<288x128xf32>
    %c0_8 = arith.constant 0 : index
    %c0_9 = arith.constant 0 : index
    %c1 = arith.constant 1 : index
    %c0_10 = arith.constant 0 : index
    %9 = vector.load %arg3[%c0_8, %c0_9, %c1, %c0_10] : memref<1x1x326x64xbf16, #tpu.memory_space<vmem>>, vector<1x1x288x64xbf16>
    %10 = vector.shape_cast %9 : vector<1x1x288x64xbf16> to vector<288x64xbf16>
    %c1_11 = arith.constant 1 : index
    %c0_12 = arith.constant 0 : index
    %c0_13 = arith.constant 0 : index
    %11 = vector.load %arg4[%c1_11, %c0_12, %c0_13] : memref<9x64x128xbf16, #tpu.memory_space<vmem>>, vector<1x64x128xbf16>
    %12 = vector.shape_cast %11 : vector<1x64x128xbf16> to vector<64x128xbf16>
    %cst_14 = arith.constant dense<0.000000e+00> : vector<288x128xf32>
    %13 = tpu.matmul %10, %12, %cst_14 {dimension_numbers = #tpu.dot_dimension_numbers<[1], [0], [0], [1], [0, 0, 1, 1], [], []>} : vector<288x64xbf16>, vector<64x128xbf16>, vector<288x128xf32> -> vector<288x128xf32>
    %14 = arith.addf %8, %13 : vector<288x128xf32>
    %c0_15 = arith.constant 0 : index
    %c0_16 = arith.constant 0 : index
    %c2 = arith.constant 2 : index
    %c0_17 = arith.constant 0 : index
    %15 = vector.load %arg3[%c0_15, %c0_16, %c2, %c0_17] : memref<1x1x326x64xbf16, #tpu.memory_space<vmem>>, vector<1x1x288x64xbf16>
    %16 = vector.shape_cast %15 : vector<1x1x288x64xbf16> to vector<288x64xbf16>
    %c2_18 = arith.constant 2 : index
    %c0_19 = arith.constant 0 : index
    %c0_20 = arith.constant 0 : index
    %17 = vector.load %arg4[%c2_18, %c0_19, %c0_20] : memref<9x64x128xbf16, #tpu.memory_space<vmem>>, vector<1x64x128xbf16>
    %18 = vector.shape_cast %17 : vector<1x64x128xbf16> to vector<64x128xbf16>
    %cst_21 = arith.constant dense<0.000000e+00> : vector<288x128xf32>
    %19 = tpu.matmul %16, %18, %cst_21 {dimension_numbers = #tpu.dot_dimension_numbers<[1], [0], [0], [1], [0, 0, 1, 1], [], []>} : vector<288x64xbf16>, vector<64x128xbf16>, vector<288x128xf32> -> vector<288x128xf32>
    %20 = arith.addf %14, %19 : vector<288x128xf32>
    %c0_22 = arith.constant 0 : index
    %c0_23 = arith.constant 0 : index
    %c18 = arith.constant 18 : index
    %c0_24 = arith.constant 0 : index
    %21 = vector.load %arg3[%c0_22, %c0_23, %c18, %c0_24] : memref<1x1x326x64xbf16, #tpu.memory_space<vmem>>, vector<1x1x288x64xbf16>
    %22 = vector.shape_cast %21 : vector<1x1x288x64xbf16> to vector<288x64xbf16>
    %c3 = arith.constant 3 : index
    %c0_25 = arith.constant 0 : index
    %c0_26 = arith.constant 0 : index
    %23 = vector.load %arg4[%c3, %c0_25, %c0_26] : memref<9x64x128xbf16, #tpu.memory_space<vmem>>, vector<1x64x128xbf16>
    %24 = vector.shape_cast %23 : vector<1x64x128xbf16> to vector<64x128xbf16>
    %cst_27 = arith.constant dense<0.000000e+00> : vector<288x128xf32>
    %25 = tpu.matmul %22, %24, %cst_27 {dimension_numbers = #tpu.dot_dimension_numbers<[1], [0], [0], [1], [0, 0, 1, 1], [], []>} : vector<288x64xbf16>, vector<64x128xbf16>, vector<288x128xf32> -> vector<288x128xf32>
    %26 = arith.addf %20, %25 : vector<288x128xf32>
    %c0_28 = arith.constant 0 : index
    %c0_29 = arith.constant 0 : index
    %c19 = arith.constant 19 : index
    %c0_30 = arith.constant 0 : index
    %27 = vector.load %arg3[%c0_28, %c0_29, %c19, %c0_30] : memref<1x1x326x64xbf16, #tpu.memory_space<vmem>>, vector<1x1x288x64xbf16>
    %28 = vector.shape_cast %27 : vector<1x1x288x64xbf16> to vector<288x64xbf16>
    %c4 = arith.constant 4 : index
    %c0_31 = arith.constant 0 : index
    %c0_32 = arith.constant 0 : index
    %29 = vector.load %arg4[%c4, %c0_31, %c0_32] : memref<9x64x128xbf16, #tpu.memory_space<vmem>>, vector<1x64x128xbf16>
    %30 = vector.shape_cast %29 : vector<1x64x128xbf16> to vector<64x128xbf16>
    %cst_33 = arith.constant dense<0.000000e+00> : vector<288x128xf32>
    %31 = tpu.matmul %28, %30, %cst_33 {dimension_numbers = #tpu.dot_dimension_numbers<[1], [0], [0], [1], [0, 0, 1, 1], [], []>} : vector<288x64xbf16>, vector<64x128xbf16>, vector<288x128xf32> -> vector<288x128xf32>
    %32 = arith.addf %26, %31 : vector<288x128xf32>
    %c0_34 = arith.constant 0 : index
    %c0_35 = arith.constant 0 : index
    %c20 = arith.constant 20 : index
    %c0_36 = arith.constant 0 : index
    %33 = vector.load %arg3[%c0_34, %c0_35, %c20, %c0_36] : memref<1x1x326x64xbf16, #tpu.memory_space<vmem>>, vector<1x1x288x64xbf16>
    %34 = vector.shape_cast %33 : vector<1x1x288x64xbf16> to vector<288x64xbf16>
    %c5 = arith.constant 5 : index
    %c0_37 = arith.constant 0 : index
    %c0_38 = arith.constant 0 : index
    %35 = vector.load %arg4[%c5, %c0_37, %c0_38] : memref<9x64x128xbf16, #tpu.memory_space<vmem>>, vector<1x64x128xbf16>
    %36 = vector.shape_cast %35 : vector<1x64x128xbf16> to vector<64x128xbf16>
    %cst_39 = arith.constant dense<0.000000e+00> : vector<288x128xf32>
    %37 = tpu.matmul %34, %36, %cst_39 {dimension_numbers = #tpu.dot_dimension_numbers<[1], [0], [0], [1], [0, 0, 1, 1], [], []>} : vector<288x64xbf16>, vector<64x128xbf16>, vector<288x128xf32> -> vector<288x128xf32>
    %38 = arith.addf %32, %37 : vector<288x128xf32>
    %c0_40 = arith.constant 0 : index
    %c0_41 = arith.constant 0 : index
    %c36 = arith.constant 36 : index
    %c0_42 = arith.constant 0 : index
    %39 = vector.load %arg3[%c0_40, %c0_41, %c36, %c0_42] : memref<1x1x326x64xbf16, #tpu.memory_space<vmem>>, vector<1x1x288x64xbf16>
    %40 = vector.shape_cast %39 : vector<1x1x288x64xbf16> to vector<288x64xbf16>
    %c6 = arith.constant 6 : index
    %c0_43 = arith.constant 0 : index
    %c0_44 = arith.constant 0 : index
    %41 = vector.load %arg4[%c6, %c0_43, %c0_44] : memref<9x64x128xbf16, #tpu.memory_space<vmem>>, vector<1x64x128xbf16>
    %42 = vector.shape_cast %41 : vector<1x64x128xbf16> to vector<64x128xbf16>
    %cst_45 = arith.constant dense<0.000000e+00> : vector<288x128xf32>
    %43 = tpu.matmul %40, %42, %cst_45 {dimension_numbers = #tpu.dot_dimension_numbers<[1], [0], [0], [1], [0, 0, 1, 1], [], []>} : vector<288x64xbf16>, vector<64x128xbf16>, vector<288x128xf32> -> vector<288x128xf32>
    %44 = arith.addf %38, %43 : vector<288x128xf32>
    %c0_46 = arith.constant 0 : index
    %c0_47 = arith.constant 0 : index
    %c37 = arith.constant 37 : index
    %c0_48 = arith.constant 0 : index
    %45 = vector.load %arg3[%c0_46, %c0_47, %c37, %c0_48] : memref<1x1x326x64xbf16, #tpu.memory_space<vmem>>, vector<1x1x288x64xbf16>
    %46 = vector.shape_cast %45 : vector<1x1x288x64xbf16> to vector<288x64xbf16>
    %c7 = arith.constant 7 : index
    %c0_49 = arith.constant 0 : index
    %c0_50 = arith.constant 0 : index
    %47 = vector.load %arg4[%c7, %c0_49, %c0_50] : memref<9x64x128xbf16, #tpu.memory_space<vmem>>, vector<1x64x128xbf16>
    %48 = vector.shape_cast %47 : vector<1x64x128xbf16> to vector<64x128xbf16>
    %cst_51 = arith.constant dense<0.000000e+00> : vector<288x128xf32>
    %49 = tpu.matmul %46, %48, %cst_51 {dimension_numbers = #tpu.dot_dimension_numbers<[1], [0], [0], [1], [0, 0, 1, 1], [], []>} : vector<288x64xbf16>, vector<64x128xbf16>, vector<288x128xf32> -> vector<288x128xf32>
    %50 = arith.addf %44, %49 : vector<288x128xf32>
    %c0_52 = arith.constant 0 : index
    %c0_53 = arith.constant 0 : index
    %c38 = arith.constant 38 : index
    %c0_54 = arith.constant 0 : index
    %51 = vector.load %arg3[%c0_52, %c0_53, %c38, %c0_54] : memref<1x1x326x64xbf16, #tpu.memory_space<vmem>>, vector<1x1x288x64xbf16>
    %52 = vector.shape_cast %51 : vector<1x1x288x64xbf16> to vector<288x64xbf16>
    %c8 = arith.constant 8 : index
    %c0_55 = arith.constant 0 : index
    %c0_56 = arith.constant 0 : index
    %53 = vector.load %arg4[%c8, %c0_55, %c0_56] : memref<9x64x128xbf16, #tpu.memory_space<vmem>>, vector<1x64x128xbf16>
    %54 = vector.shape_cast %53 : vector<1x64x128xbf16> to vector<64x128xbf16>
    %cst_57 = arith.constant dense<0.000000e+00> : vector<288x128xf32>
    %55 = tpu.matmul %52, %54, %cst_57 {dimension_numbers = #tpu.dot_dimension_numbers<[1], [0], [0], [1], [0, 0, 1, 1], [], []>} : vector<288x64xbf16>, vector<64x128xbf16>, vector<288x128xf32> -> vector<288x128xf32>
    %56 = arith.addf %50, %55 : vector<288x128xf32>
    %cst_58 = arith.constant 0.000000e+00 : f32
    %57 = vector.broadcast %cst_58 : f32 to vector<288x128xf32>
    %58 = arith.maximumf %56, %57 : vector<288x128xf32>
    %59 = arith.truncf %58 : vector<288x128xf32> to vector<288x128xbf16>
    %c0_59 = arith.constant 0 : index
    %c0_60 = arith.constant 0 : index
    %c0_61 = arith.constant 0 : index
    %60 = vector.load %arg6[%c0_59, %c0_60, %c0_61] : memref<1x288x128xbf16, #tpu.memory_space<vmem>>, vector<1x288x128xbf16>
    %61 = vector.shape_cast %60 : vector<1x288x128xbf16> to vector<288x128xbf16>
    %62 = vector.shape_cast %59 : vector<288x128xbf16> to vector<1x288x128xbf16>
    tpu.vector_store %arg6[%c0_59, %c0_60, %c0_61], %62 {strides = array<i32>} : memref<1x288x128xbf16, #tpu.memory_space<vmem>>, vector<1x288x128xbf16>,
    return
  }
  func.func @transform_0(%arg0: i32, %arg1: i32, %arg2: i32) -> (i32, i32, i32, i32) {
    %c0_i32 = arith.constant 0 : i32
    %c0_i32_0 = arith.constant 0 : i32
    %c0_i32_1 = arith.constant 0 : i32
    return %arg0, %arg1, %c0_i32, %c0_i32_0 : i32, i32, i32, i32
  }
  func.func @transform_1(%arg0: i32, %arg1: i32, %arg2: i32) -> (i32, i32, i32) {
    %c0_i32 = arith.constant 0 : i32
    %c0_i32_0 = arith.constant 0 : i32
    %c0_i32_1 = arith.constant 0 : i32
    return %c0_i32, %c0_i32_0, %arg2 : i32, i32, i32
  }
  func.func @transform_2(%arg0: i32, %arg1: i32, %arg2: i32) -> (i32, i32) {
    %c0_i32 = arith.constant 0 : i32
    %c0_i32_0 = arith.constant 0 : i32
    return %c0_i32, %arg2 : i32, i32
  }
  func.func @transform_3(%arg0: i32, %arg1: i32, %arg2: i32) -> (i32, i32, i32) {
    %c0_i32 = arith.constant 0 : i32
    return %arg0, %arg1, %arg2 : i32, i32, i32
  }
}

</mosaic_0001>

<bundles_post_ra>
// kernel: tpu_custom_call.1
= control target key start
LH: loop header
LB: loop body
LE: loop exit
PB: predicated region body
PF: predicated region fallthrough
CT: control target
= control target key end

     0   :  { %8 = vsyncpa [#allocation3], 0  ;;  %s6937_s0 = inlined_call_operand.vmem [shape: bf16[1,1,326,64], index: 0, kind: input, shape index: {}]   ;;  %s6938_s1 = inlined_call_operand.hbm [shape: bf16[9,64,128], index: 1, kind: input, shape index: {}]   ;;  %s6939_s2 = inlined_call_operand.vmem [shape: f32[1,128], index: 2, kind: input, shape index: {}]   ;;  %s6940_s3 = inlined_call_operand.hbm [shape: bf16[1,288,128], index: 3, kind: output, shape index: {}]  }
   0x1   :  { %9 = vsyncpa [#allocation4], 0  ;;  %s5409_s12 = smov [#allocation2]  }
   0x2   :  { %s17_s13 = sshll.u32 %s5409_s12, 4  ;;  %s18_s13 = int_to_ptr.vmem [resolvable:$true] %s17_s13 }
   0x3   :  { %s5373_s14 = scalar_lea.vmem %s18_s13, 4608  ;;  %p5378_p1 = scmp.lt.s32.totalorder %s18_s13, %s18_s13 }
   0x4   :  { %p5374_p0 = scmp.ne.s32.totalorder %s18_s13, %s5373_s14  ;;  %p5379_p2 = scmp.lt.s32.totalorder %s5373_s14, %s5373_s14 }
   0x6   :  { %p5380_p3 = por %p5379_p2, %p5378_p1 }
   0x8   :  { %p5381_p4 = pnand %p5380_p3, %p5374_p0 }
   0xa   :  { %5384 = shalt.err (!%p5381_p4)
}
   0xb   :  { %s5410_s15 = smov 64   ;;  %s5411_s16 = smov 4  }
   0xc   :  { %23 = dma.hbm_to_vmem [thread:$0]  %s6938_s1, 4608, %s18_s13, [#allocation3], %s5410_s15, %s5410_s15, %s5411_s16  }
   0xd   :  { %5405 = dma.done.wait [#allocation3], 4608  }
   0xe   :  { %5406 = vsyncadd [#allocation3], 4294962688  ;;  %v5249_v0 = vld [vmem:[#allocation2 + $0x18] sm:$0xff]   ;;  %v5250_v1 = vld [vmem:[#allocation2 + $0x10] sm:$0xff]   ;;  %vm195_vm0 = vcmask 523264   ;;  %vm1055_vm2 = vcmask 1046528  }
   0xf   :  { %4841 = vmatprep.subr.bf16.mxu0 %v5249_v0  ;;  %5237 = vmatprep.subr.bf16.mxu1 %v5249_v0  ;;  %v5251_v2 = vld [vmem:[#allocation2 + $0x8] sm:$0xff]   ;;  %v5253_v3 = vld [vmem:[%s6937_s0] sm:$0xff]   ;;  %v5254_v4 = vld [vmem:[%s6937_s0 + $0x50] sm:$0xff]   ;;  %vm602_vm1 = vsmask.f32 7424  ;;  %vm2339_vm3 = vcmask 1045504  }
  0x10   :  { %4842 = vmatpush3.bf16.msra.mxu0 %v5249_v0  ;;  %5241 = vmatpush3.bf16.msra.mxu1 %v5249_v0  ;;  %v5252_v5 = vld [vmem:[#allocation2] sm:$0xff]   ;;  %v5257_v6 = vld [vmem:[#allocation2 + $0x58] sm:$0xff]   ;;  %v5255_v7 = vld [vmem:[%s6937_s0 + $0x8] sm:$0xff]   ;;  %vm1864_vm4 = vsmask.f32 6400  ;;  %vm3623_vm5 = vcmask 1044480  }
  0x11   :  { %4843 = vmatprep.subr.bf16.mxu0 %v5250_v1  ;;  %5238 = vmatprep.subr.bf16.mxu1 %v5250_v1  ;;  %v5258_v8 = vld [vmem:[#allocation2 + $0x38] sm:$0xff]   ;;  %v5259_v10 = vld [vmem:[%s6937_s0 + $0x10] sm:$0xff]   ;;  %v5260_v11 = vld [vmem:[%s6937_s0 + $0x60] sm:$0xff]   ;;  %vm3148_vm6 = vsmask.f32 5376 }
  0x12   :  { %4849 = vmatprep.mubr.msk.bf16.mxu0 %vm195_vm0, %v5253_v3  ;;  %4869 = vmatprep.mubr.msk.bf16.mxu1 %vm195_vm0, %v5254_v4  ;;  %v5256_v9 = vld [vmem:[%s6937_s0 + $0x58] sm:$0xff]   ;;  %v5263_v12 = vld [vmem:[#allocation2 + $0x50] sm:$0xff]   ;;  %v5262_v15 = vld [vmem:[%s6937_s0 + $0x68] sm:$0xff]  }
  0x13   :  { %v5264_v13 = vld [vmem:[#allocation2 + $0x30] sm:$0xff]   ;;  %v5261_v14 = vld [vmem:[%s6937_s0 + $0x18] sm:$0xff]   ;;  %v5269_v16 = vld [vmem:[#allocation2 + $0x48] sm:$0xff]  }
  0x14   :  { %4844 = vmatpush3.bf16.msra.mxu0 %v5250_v1  ;;  %5242 = vmatpush3.bf16.msra.mxu1 %v5250_v1  ;;  %v5270_v17 = vld [vmem:[#allocation2 + $0x28] sm:$0xff]   ;;  %v5265_v18 = vld [vmem:[%s6937_s0 + $0x20] sm:$0xff]   ;;  %v5266_v19 = vld [vmem:[%s6937_s0 + $0x70] sm:$0xff]  }
  0x15   :  { %4845 = vmatprep.subr.bf16.mxu0 %v5251_v2  ;;  %5239 = vmatprep.subr.bf16.mxu1 %v5251_v2  ;;  %v5275_v20 = vld [vmem:[#allocation2 + $0x20] sm:$0xff]   ;;  %v5267_v22 = vld [vmem:[%s6937_s0 + $0x28] sm:$0xff]   ;;  %v5268_v23 = vld [vmem:[%s6937_s0 + $0x78] sm:$0xff]  }
  0x16   :  { %v5276_v21 = vld [vmem:[#allocation2 + $0x40] sm:$0xff]   ;;  %v5271_v24 = vld [vmem:[%s6937_s0 + $0x30] sm:$0xff]   ;;  %v5497_v28 = vld [vmem:[%s6937_s0 + $0x8] sm:$0xff]  }
  0x17   :  { %v463_v25 = vld [vmem:[%s6937_s0] sm:$0xf]  ;;  %v464_v26 = vld [vmem:[%s6937_s0 + $0x4] sm:$0xf]  ;;  %v611_v32 = vshll.u32 %v5497_v28, 16  ;;  %v5508_v34 = vld [vmem:[%s6937_s0 + $0x10] sm:$0xff]  }
  0x18   :  { %4846 = vmatpush3.bf16.msra.mxu0 %v5251_v2  ;;  %5243 = vmatpush3.bf16.msra.mxu1 %v5251_v2  ;;  %v4226_v27 = vcombine.low %v463_v25, %v464_v26  ;;  %v5272_v29 = vld [vmem:[%s6937_s0 + $0x80] sm:$0xff]   ;;  %v5282_v35 = vld [vmem:[#allocation2 + $0x78] sm:$0xff]   ;;  %v5274_v42 = vld [vmem:[%s6937_s0 + $0x88] sm:$0xff]   ;;  %v619_v44 = vshll.u32 %v5508_v34, 16  ;;  %v615_v45 = vshrl.u32 %v5497_v28, 16  ;;  %v623_v48 = vshrl.u32 %v5508_v34, 16 }
  0x19   :  { %4847 = vmatprep.subr.bf16.mxu0 %v5252_v5  ;;  %5240 = vmatprep.subr.bf16.mxu1 %v5252_v5  ;;  %v5515_v36 = vld [vmem:[%s6937_s0 + $0x18] sm:$0xff]   ;;  %v613_v39 = vrot.slane %v611_v32, 1  ;;  %v1042_v40 = vld [vmem:[%s6937_s0] sm:$0xe]  ;;  %v1057_v54 = vrot.slane %v5497_v28, 1  ;;  %v5547_v57 = vld [vmem:[%s6937_s0 + $0x28] sm:$0xff]  }
  0x1a   :  { %v604_v30 = vshrl.u32 %v4226_v27, 16  ;;  %v606_v31 = vshll.u32 %v4226_v27, 16  ;;  %v5273_v37 = vld [vmem:[%s6937_s0 + $0x38] sm:$0xff]   ;;  %v5277_v43 = vld [vmem:[%s6937_s0 + $0x40] sm:$0xff]   ;;  %v627_v46 = vshll.u32 %v5515_v36, 16  ;;  %v4267_v49 = vcombine.low %v1042_v40, %v464_v26  ;;  %v5280_v58 = vld [vmem:[%s6937_s0 + $0x48] sm:$0xff]  }
  0x1b   :  { %v5286_v41 = vld [vmem:[#allocation2 + $0x98] sm:$0xff]   ;;  %v621_v50 = vrot.slane %v619_v44, 1  ;;  %v5539_v51 = vld [vmem:[%s6937_s0 + $0x20] sm:$0xff]   ;;  %v617_v52 = vor.u32 %v615_v45, %v613_v39  ;;  %v631_v61 = vshrl.u32 %v5515_v36, 16  ;;  %v643_v1 = vshll.u32 %v5547_v57, 16  ;;  %v5291_v2 = vld [vmem:[#allocation2 + $0x70] sm:$0xff]  }
  0x1c   :  { %4848 = vmatpush3.bf16.msra.mxu0 %v5252_v5  ;;  %5244 = vmatpush3.bf16.msra.mxu1 %v5252_v5  ;;  %v608_v33 = vrot.slane %v606_v31, 1  ;;  %v629_v53 = vrot.slane %v627_v46, 1  ;;  %v1056_v56 = vrot.slane %v4267_v49, 1  ;;  %v635_v59 = vshll.u32 %v5539_v51, 16  ;;  %v5564_v4 = vld [vmem:[%s6937_s0 + $0x30] sm:$0xff]  }
  0x1d   :  { %4929 = vmatprep.subr.bf16.mxu0 %v5257_v6  ;;  %4885 = vmatprep.subr.bf16.mxu1 %v5258_v8  ;;  %v625_v55 = vor.u32 %v623_v48, %v621_v50  ;;  %v622_v60 = vsel %vm602_vm1, %v617_v52, %v621_v50  ;;  %v639_v0 = vshrl.u32 %v5539_v51, 16  ;;  %v1063_v25 = vrot.slane %v5539_v51, 1  ;;  %v5623_v48 = vld [vmem:[#allocation2 + $0xb8] sm:$0xff]  }
  0x1e   :  { %v609_v38 = vor.u32 %v608_v33, %v604_v30  ;;  %v1058_v63 = vsel %vm1055_vm2, %v1056_v56, %v1057_v54  ;;  %v637_v3 = vrot.slane %v635_v59, 1  ;;  %v633_v5 = vor.u32 %v631_v61, %v629_v53  ;;  %v5298_v30 = vld [vmem:[#allocation2 + $0x88] sm:$0xff]   ;;  %v5641_v59 = vld [vmem:[%s6937_s0 + $0x60] sm:$0xff]  }
  0x1f   :  { %4850 = vmatmul.mubr.msk.bf16.vlgmr.msra.gmra.mxu0 %vm195_vm0, %v5255_v7  ;;  %4870 = vmatmul.mubr.msk.bf16.vlgmr.msra.gmra.mxu1 %vm195_vm0, %v5256_v9  ;;  %v630_v62 = vsel %vm602_vm1, %v625_v55, %v629_v53  ;;  %v5572_v9 = vld [vmem:[%s6937_s0 + $0x38] sm:$0xff]   ;;  %v1065_v28 = vrot.slane %v5547_v57, 1 }
  0x20   :  { %4930 = vmatpush3.bf16.msra.mxu0 %v5257_v6  ;;  %4853 = vmatprep.mubr.msk.bf16.mxu0 %vm195_vm0, %v5259_v10  ;;  %v614_v47 = vsel %vm602_vm1, %v609_v38, %v613_v39  ;;  %v1059_v6 = vrot.slane %v5508_v34, 1  ;;  %v641_v7 = vor.u32 %v639_v0, %v637_v3  ;;  %v1061_v10 = vrot.slane %v5515_v36, 1  ;;  %v5304_v39 = vld [vmem:[#allocation2 + $0x80] sm:$0xff]  }
  0x21   :  { %4873 = vmatprep.mubr.msk.bf16.mxu1 %vm195_vm0, %v5260_v11  ;;  %4886 = vmatpush3.bf16.msra.mxu1 %v5258_v8  ;;  %v645_v8 = vrot.slane %v643_v1, 1  ;;  %v5297_v11 = vld [vmem:[#allocation2 + $0x68] sm:$0xff]   ;;  %v663_v34 = vshrl.u32 %v5572_v9, 16  ;;  %v1066_v36 = vsel %vm1055_vm2, %v1063_v25, %v1065_v28  ;;  %v1069_v46 = vrot.slane %v5572_v9, 1 }
  0x22   :  { %4931 = vmatprep.subr.bf16.mxu0 %v5263_v12  ;;  %4887 = vmatprep.subr.bf16.mxu1 %v5264_v13  ;;  %v1064_v33 = vsel %vm1055_vm2, %v1061_v10, %v1063_v25  ;;  %v5650_v1 = vld [vmem:[%s6937_s0 + $0x68] sm:$0xff]  }
  0x24   :  { %4932 = vmatpush3.bf16.msra.mxu0 %v5263_v12  ;;  %v651_v12 = vshll.u32 %v5564_v4, 16 }
  0x25   :  { %4888 = vmatpush3.bf16.msra.mxu1 %v5264_v13  ;;  %4933 = vmatprep.subr.bf16.mxu0 %v5269_v16  ;;  %v638_v13 = vsel %vm602_vm1, %v633_v5, %v637_v3 }
  0x26   :  { %4889 = vmatprep.subr.bf16.mxu1 %v5270_v17 }
  0x27   :  { %4854 = vmatmul.mubr.msk.bf16.gmra.mxu0 %vm195_vm0, %v5261_v14  ;;  %4874 = vmatmul.mubr.msk.bf16.gmra.mxu1 %vm195_vm0, %v5262_v15  ;;  %v1060_v14 = vsel %vm1055_vm2, %v1057_v54, %v1059_v6  ;;  %v647_v15 = vshrl.u32 %v5547_v57, 16  ;;  %v5634_v57 = vld [vmem:[#allocation2 + $0xd8] sm:$0xff]  }
  0x28   :  { %4857 = vmatprep.mubr.msk.bf16.mxu0 %vm195_vm0, %v5265_v18  ;;  %4877 = vmatprep.mubr.msk.bf16.mxu1 %vm195_vm0, %v5266_v19  ;;  %v659_v18 = vshll.u32 %v5572_v9, 16  ;;  %v5292_v19 = vld [vmem:[#allocation2 + $0x90] sm:$0xff]   ;;  %v707_v9 = vshll.u32 %v5650_v1, 16 }
  0x29   :  { %4934 = vmatpush3.bf16.msra.mxu0 %v5269_v16  ;;  %4890 = vmatpush3.bf16.msra.mxu1 %v5270_v17  ;;  %v655_v16 = vshrl.u32 %v5564_v4, 16  ;;  %v646_v17 = vsel %vm602_vm1, %v641_v7, %v645_v8 }
  0x2a   :  { %4891 = vmatprep.subr.bf16.mxu1 %v5275_v20  ;;  %4935 = vmatprep.subr.bf16.mxu0 %v5276_v21  ;;  %v661_v27 = vrot.slane %v659_v18, 1 }
  0x2d   :  { %4892 = vmatpush3.bf16.msra.mxu1 %v5275_v20  ;;  %4936 = vmatpush3.bf16.msra.mxu0 %v5276_v21  ;;  %v1062_v20 = vsel %vm1055_vm2, %v1059_v6, %v1061_v10  ;;  %v653_v21 = vrot.slane %v651_v12, 1 }
  0x2e   :  { %4973 = vmatprep.subr.bf16.mxu1 %v5282_v35  ;;  %5017 = vmatprep.subr.bf16.mxu0 %v5286_v41 }
  0x2f   :  { %4858 = vmatmul.mubr.msk.bf16.gmra.mxu0 %vm195_vm0, %v5267_v22  ;;  %4878 = vmatmul.mubr.msk.bf16.gmra.mxu1 %vm195_vm0, %v5268_v23  ;;  %v5588_v22 = vld [vmem:[%s6937_s0 + $0x40] sm:$0xff]   ;;  %v657_v26 = vor.u32 %v655_v16, %v653_v21 }
  0x30   :  { %4861 = vmatprep.mubr.msk.bf16.mxu0 %vm195_vm0, %v5271_v24  ;;  %4881 = vmatprep.mubr.msk.bf16.mxu1 %vm195_vm0, %v5272_v29  ;;  %v5303_v23 = vld [vmem:[#allocation2 + $0x60] sm:$0xff]   ;;  %v649_v24 = vor.u32 %v647_v15, %v645_v8  ;;  %v5597_v29 = vld [vmem:[%s6937_s0 + $0x48] sm:$0xff]   ;;  %v667_v31 = vshll.u32 %v5588_v22, 16  ;;  %v1071_v61 = vrot.slane %v5588_v22, 1  ;;  %v703_v8 = vshrl.u32 %v5641_v59, 16 }
  0x31   :  { %v675_v38 = vshll.u32 %v5597_v29, 16  ;;  %v679_v52 = vshrl.u32 %v5597_v29, 16  ;;  %v1073_v0 = vrot.slane %v5597_v29, 1  ;;  %v709_v15 = vrot.slane %v707_v9, 1 }
  0x32   :  { %v654_v32 = vsel %vm602_vm1, %v649_v24, %v653_v21  ;;  %v669_v40 = vrot.slane %v667_v31, 1  ;;  %v711_v21 = vshrl.u32 %v5650_v1, 16 }
  0x33   :  { %v677_v45 = vrot.slane %v675_v38, 1  ;;  %v1074_v7 = vsel %vm1055_vm2, %v1071_v61, %v1073_v0 }
  0x34   :  { %v713_v29 = vor.u32 %v711_v21, %v709_v15 }
  0x37   :  { %4862 = vmatmul.mubr.msk.bf16.gmra.mxu0 %vm195_vm0, %v5273_v37  ;;  %4882 = vmatmul.mubr.msk.bf16.gmra.mxu1 %vm195_vm0, %v5274_v42  ;;  %v671_v37 = vshrl.u32 %v5588_v22, 16  ;;  %v665_v42 = vor.u32 %v663_v34, %v661_v27  ;;  %v5684_v22 = vld [vmem:[%s6937_s0 + $0x80] sm:$0xff]   ;;  %v1081_v34 = vrot.slane %v5650_v1, 1 }
  0x38   :  { %4865 = vmatprep.mubr.msk.bf16.mxu0 %vm195_vm0, %v5277_v43  ;;  %4893 = vmatprep.mubr.msk.bf16.mxu1 %vm195_vm0, %v614_v47  ;;  %v1067_v43 = vrot.slane %v5564_v4, 1  ;;  %v5621_v47 = vld [vmem:[%s6937_s0 + $0x58] sm:$0xff]   ;;  %v1072_v4 = vsel %vm1055_vm2, %v1069_v46, %v1071_v61  ;;  %v731_v31 = vshll.u32 %v5684_v22, 16  ;;  %v1087_v61 = vrot.slane %v5684_v22, 1 }
  0x39   :  { %v673_v44 = vor.u32 %v671_v37, %v669_v40  ;;  %v670_v50 = vsel %vm602_vm1, %v665_v42, %v669_v40  ;;  %v691_v56 = vshll.u32 %v5621_v47, 16  ;;  %v695_v5 = vshrl.u32 %v5621_v47, 16 }
  0x3a   :  { %v1068_v51 = vsel %vm1055_vm2, %v1065_v28, %v1067_v43  ;;  %v1070_v54 = vsel %vm1055_vm2, %v1067_v43, %v1069_v46  ;;  %v1077_v16 = vrot.slane %v5621_v47, 1  ;;  %v5695_v28 = vld [vmem:[%s6937_s0 + $0x88] sm:$0xff]   ;;  %v735_v37 = vshrl.u32 %v5684_v22, 16  ;;  %v5714_v43 = vld [vmem:[%s6937_s0 + $0x90] ss:$0 sps:$4 sm:$0x11]  }
  0x3b   :  { %v678_v53 = vsel %vm602_vm1, %v673_v44, %v677_v45  ;;  %v739_v38 = vshll.u32 %v5695_v28, 16  ;;  %v733_v42 = vrot.slane %v731_v31, 1  ;;  %v1385_v46 = vld [vmem:[%s6937_s0 + $0xc] sm:$0xf] }
  0x3f   :  { %4866 = vmatmul.mubr.msk.bf16.gmra.mxu0 %vm195_vm0, %v5280_v58  ;;  %4894 = vmatmul.mubr.msk.bf16.vlgmr.msra.gmra.mxu1 %vm195_vm0, %v622_v60  ;;  %v681_v60 = vor.u32 %v679_v52, %v677_v45  ;;  %v5727_v52 = vld [vmem:[%s6937_s0 + $0x10] sm:$0xff]  }
  0x40   :  { %4897 = vmatprep.mubr.msk.bf16.mxu1 %vm195_vm0, %v630_v62  ;;  %4937 = vmatprep.mubr.msk.bf16.mxu0 %vm195_vm0, %v1058_v63  ;;  %v693_v63 = vrot.slane %v691_v56, 1 }
  0x41   :  { %4974 = vmatpush3.bf16.msra.mxu1 %v5282_v35  ;;  %v662_v35 = vsel %vm602_vm1, %v657_v26, %v661_v27 }
  0x42   :  { %4975 = vmatprep.subr.bf16.mxu1 %v5291_v2  ;;  %v697_v12 = vor.u32 %v695_v5, %v693_v63 }
  0x45   :  { %4976 = vmatpush3.bf16.msra.mxu1 %v5291_v2  ;;  %v699_v2 = vshll.u32 %v5641_v59, 16 }
  0x46   :  { %4977 = vmatprep.subr.bf16.mxu1 %v5297_v11 }
  0x47   :  { %4898 = vmatmul.mubr.msk.bf16.gmra.mxu1 %vm195_vm0, %v638_v13  ;;  %4938 = vmatmul.mubr.msk.bf16.vlgmr.msra.gmra.mxu0 %vm195_vm0, %v1060_v14  ;;  %v701_v10 = vrot.slane %v699_v2, 1  ;;  %v1089_v2 = vrot.slane %v5695_v28, 1 }
  0x48   :  { %5018 = vmatpush3.bf16.msra.mxu0 %v5286_v41  ;;  %4901 = vmatprep.mubr.msk.bf16.mxu1 %vm195_vm0, %v646_v17  ;;  %v5612_v41 = vld [vmem:[%s6937_s0 + $0x50] sm:$0xff]   ;;  %v5675_v17 = vld [vmem:[%s6937_s0 + $0x78] sm:$0xff]  }
  0x49   :  { %4941 = vmatprep.mubr.msk.bf16.mxu0 %vm195_vm0, %v1062_v20  ;;  %5019 = vmatprep.subr.bf16.mxu0 %v5292_v19  ;;  %v683_v49 = vshll.u32 %v5612_v41, 16  ;;  %v687_v55 = vshrl.u32 %v5612_v41, 16  ;;  %v1075_v13 = vrot.slane %v5612_v41, 1  ;;  %v705_v14 = vor.u32 %v703_v8, %v701_v10 }
  0x4a   :  { %4978 = vmatpush3.bf16.msra.mxu1 %v5297_v11  ;;  %v5666_v11 = vld [vmem:[%s6937_s0 + $0x70] sm:$0xff]   ;;  %v723_v26 = vshll.u32 %v5675_v17, 16 }
  0x4b   :  { %4979 = vmatprep.subr.bf16.mxu1 %v5303_v23  ;;  %v685_v58 = vrot.slane %v683_v49, 1  ;;  %v715_v18 = vshll.u32 %v5666_v11, 16  ;;  %v1076_v20 = vsel %vm1055_vm2, %v1073_v0, %v1075_v13  ;;  %v1078_v24 = vsel %vm1055_vm2, %v1075_v13, %v1077_v16 }
  0x4c   :  { %5020 = vmatpush3.bf16.msra.mxu0 %v5292_v19  ;;  %v702_v19 = vsel %vm602_vm1, %v697_v12, %v701_v10  ;;  %v719_v25 = vshrl.u32 %v5666_v11, 16  ;;  %v1085_v49 = vrot.slane %v5675_v17, 1  ;;  %v1874_v10 = vshrl.u32 %v5727_v52, 16 }
  0x4d   :  { %5021 = vmatprep.subr.bf16.mxu0 %v5298_v30  ;;  %v689_v62 = vor.u32 %v687_v55, %v685_v58  ;;  %v686_v3 = vsel %vm602_vm1, %v681_v60, %v685_v58  ;;  %v717_v27 = vrot.slane %v715_v18, 1  ;;  %v5735_v55 = vld [vmem:[%s6937_s0 + $0x18] sm:$0xff]   ;;  %v743_v58 = vshrl.u32 %v5695_v28, 16 }
  0x4e   :  { %4980 = vmatpush3.bf16.msra.mxu1 %v5303_v23  ;;  %v710_v23 = vsel %vm602_vm1, %v705_v14, %v709_v15  ;;  %v1526_v8 = vrot.slane %v5735_v55, 1  ;;  %v5765_v15 = vld [vmem:[%s6937_s0 + $0x28] sm:$0xff]   ;;  %v1886_v18 = vshll.u32 %v5735_v55, 16  ;;  %v2343_v22 = vrot.slane %v5735_v55, 2 }
  0x4f   :  { %4902 = vmatmul.mubr.msk.bf16.gmra.mxu1 %vm195_vm0, %v654_v32  ;;  %4942 = vmatmul.mubr.msk.bf16.gmra.mxu0 %vm195_vm0, %v1064_v33  ;;  %v694_v6 = vsel %vm602_vm1, %v689_v62, %v693_v63  ;;  %v721_v32 = vor.u32 %v719_v25, %v717_v27  ;;  %v725_v33 = vrot.slane %v723_v26, 1  ;;  %v718_v40 = vsel %vm602_vm1, %v713_v29, %v717_v27 }
  0x50   :  { %4905 = vmatprep.mubr.msk.bf16.mxu1 %vm195_vm0, %v662_v35  ;;  %4945 = vmatprep.mubr.msk.bf16.mxu0 %vm195_vm0, %v1066_v36  ;;  %v727_v35 = vshrl.u32 %v5675_v17, 16  ;;  %v1083_v36 = vrot.slane %v5666_v11, 1  ;;  %v1877_v11 = vshll.u32 %v5727_v52, 16  ;;  %v1883_v17 = vshrl.u32 %v5735_v55, 16 }
  0x51   :  { %5022 = vmatpush3.bf16.msra.mxu0 %v5298_v30  ;;  %5061 = vmatprep.subr.bf16.mxu1 %v5623_v48  ;;  %v1079_v30 = vrot.slane %v5641_v59, 1  ;;  %v726_v44 = vsel %vm602_vm1, %v721_v32, %v725_v33  ;;  %v5742_v59 = vld [vmem:[%s6937_s0 + $0x20] sm:$0xff]   ;;  %v1088_v27 = vsel %vm1055_vm2, %v1085_v49, %v1087_v61 }
  0x52   :  { %5023 = vmatprep.subr.bf16.mxu0 %v5304_v39  ;;  %v729_v47 = vor.u32 %v727_v35, %v725_v33  ;;  %v1084_v56 = vsel %vm1055_vm2, %v1081_v34, %v1083_v36  ;;  %v1086_v1 = vsel %vm1055_vm2, %v1083_v36, %v1085_v49  ;;  %v1528_v9 = vrot.slane %v5742_v59, 1 }
  0x53   :  { %v1080_v41 = vsel %vm1055_vm2, %v1077_v16, %v1079_v30  ;;  %v1082_v45 = vsel %vm1055_vm2, %v1079_v30, %v1081_v34  ;;  %v2341_v16 = vrot.slane %v5727_v52, 2  ;;  %v1879_v25 = vrot.slane %v1877_v11, 2  ;;  %v5789_v30 = vld [vmem:[%s6937_s0 + $0x38] sm:$0xff]  }
  0x54   :  { %v734_v60 = vsel %vm602_vm1, %v729_v47, %v733_v42  ;;  %v1892_v29 = vshrl.u32 %v5742_v59, 16  ;;  %v1530_v33 = vrot.slane %v5765_v15, 1  ;;  %v1885_v34 = vrot.slane %v1883_v17, 1 }
  0x55   :  { %5024 = vmatpush3.bf16.msra.mxu0 %v5304_v39  ;;  %v1384_v39 = vld [vmem:[%s6937_s0 + $0x8] sm:$0xe]  ;;  %v5792_v31 = vsel %vm2339_vm3, %v2341_v16, %v2343_v22  ;;  %v1888_v35 = vrot.slane %v1886_v18, 2  ;;  %v2347_v36 = vrot.slane %v5765_v15, 2  ;;  %v1534_v11 = vrot.slane %v5789_v30, 1  ;;  %v5318_v18 = vld [vmem:[#allocation2 + $0xb0] sm:$0xff]  }
  0x56   :  { %5105 = vmatprep.subr.bf16.mxu0 %v5634_v57  ;;  %v1894_v49 = vrot.slane %v1892_v29, 1  ;;  %v5924_v29 = vld [vmem:[%s6937_s0 + $0x88] sm:$0xff]  }
  0x57   :  { %4906 = vmatmul.mubr.msk.bf16.gmra.mxu1 %vm195_vm0, %v670_v50  ;;  %4946 = vmatmul.mubr.msk.bf16.gmra.mxu0 %vm195_vm0, %v1068_v51  ;;  %v737_v50 = vor.u32 %v735_v37, %v733_v42  ;;  %v741_v51 = vrot.slane %v739_v38, 1  ;;  %v1090_v42 = vsel %vm1055_vm2, %v1087_v61, %v1089_v2 }
  0x58   :  { %4909 = vmatprep.mubr.msk.bf16.mxu1 %vm195_vm0, %v678_v53  ;;  %4949 = vmatprep.mubr.msk.bf16.mxu0 %vm195_vm0, %v1070_v54  ;;  %v747_v53 = vshll.u32 %v5714_v43, 16  ;;  %v4290_v54 = vcombine.low %v1384_v39, %v1385_v46  ;;  %v5804_v39 = vld [vmem:[%s6937_s0 + $0x40] sm:$0xff]  }
  0x59   :  { %v742_v0 = vsel %vm602_vm1, %v737_v50, %v741_v51  ;;  %v745_v21 = vor.u32 %v743_v58, %v741_v51  ;;  %v1901_v58 = vshrl.u32 %v5765_v15, 16 }
  0x5a   :  { %v1866_v62 = vshrl.u32 %v4290_v54, 16  ;;  %v1869_v63 = vshll.u32 %v4290_v54, 16  ;;  %v749_v5 = vrot.slane %v747_v53, 1  ;;  %v2353_v53 = vrot.slane %v5804_v39, 2 }
  0x5c   :  { %v5758_v13 = vrot.slane %v1866_v62, 1  ;;  %v5760_v14 = vrot.slane %v1869_v63, 2  ;;  %v750_v37 = vsel %vm602_vm1, %v745_v21, %v749_v5  ;;  %v5863_v5 = vld [vmem:[%s6937_s0 + $0x68] sm:$0xff]  }
  0x5d   :  { %v2363_v28 = vrot.slane %v5863_v5, 2 }
  0x5e   :  { %v1872_v62 = vor.u32 %v5760_v14, %v5758_v13 }
  0x5f   :  { %4910 = vmatmul.mubr.msk.bf16.gmra.mxu1 %vm195_vm0, %v686_v3  ;;  %4950 = vmatmul.mubr.msk.bf16.gmra.mxu0 %vm195_vm0, %v1072_v4  ;;  %v1524_v3 = vrot.slane %v5727_v52, 1  ;;  %v2326_v4 = vld [vmem:[%s6937_s0 + $0x8] sm:$0xc] }
  0x60   :  { %4913 = vmatprep.mubr.msk.bf16.mxu1 %vm195_vm0, %v694_v6  ;;  %4953 = vmatprep.mubr.msk.bf16.mxu0 %vm195_vm0, %v1074_v7  ;;  %v1523_v6 = vrot.slane %v4290_v54, 1  ;;  %v1091_v7 = vrot.slane %v5714_v43, 1  ;;  %v4354_v12 = vcombine.low %v2326_v4, %v1385_v46  ;;  %v5818_v46 = vld [vmem:[%s6937_s0 + $0x48] sm:$0xff]   ;;  %v5835_v54 = vld [vmem:[%s6937_s0 + $0x50] sm:$0xff]  }
  0x61   :  { %v2357_v4 = vrot.slane %v5835_v54, 2  ;;  %v1527_v14 = vsel %vm1055_vm2, %v1524_v3, %v1526_v8 }
  0x67   :  { %4914 = vmatmul.mubr.msk.bf16.gmra.mxu1 %vm195_vm0, %v702_v19  ;;  %4954 = vmatmul.mubr.msk.bf16.gmra.mxu0 %vm195_vm0, %v1076_v20  ;;  %v5775_v19 = vld [vmem:[%s6937_s0 + $0x30] sm:$0xff]   ;;  %v2340_v20 = vrot.slane %v4354_v12, 2 }
  0x68   :  { %4917 = vmatprep.mubr.msk.bf16.mxu1 %vm195_vm0, %v710_v23  ;;  %4957 = vmatprep.mubr.msk.bf16.mxu0 %vm195_vm0, %v1078_v24  ;;  %v2345_v23 = vrot.slane %v5742_v59, 2  ;;  %v1876_v24 = vrot.slane %v1874_v10, 1  ;;  %v1532_v38 = vrot.slane %v5775_v19, 1  ;;  %v1092_v10 = vsel %vm1055_vm2, %v1089_v2, %v1091_v7 }
  0x69   :  { %v5782_v26 = vsel %vm2339_vm3, %v2340_v20, %v2341_v16  ;;  %v1904_v16 = vshll.u32 %v5765_v15, 16  ;;  %v1529_v2 = vsel %vm1055_vm2, %v1526_v8, %v1528_v9  ;;  %v5898_v20 = vld [vmem:[%s6937_s0 + $0x70] sm:$0xff]   ;;  %v1910_v55 = vshrl.u32 %v5775_v19, 16  ;;  %v5909_v8 = vld [vmem:[%s6937_s0 + $0x78] sm:$0xff]   ;;  %v5330_v15 = vld [vmem:[#allocation2 + $0xa0] sm:$0xff]  }
  0x6a   :  { %v5795_v32 = vsel %vm2339_vm3, %v2343_v22, %v2345_v23  ;;  %v5821_v47 = vsel %vm2339_vm3, %v2345_v23, %v2347_v36  ;;  %v1880_v63 = vor.u32 %v1879_v25, %v1876_v24  ;;  %v1889_v22 = vor.u32 %v1888_v35, %v1885_v34  ;;  %v5917_v25 = vld [vmem:[%s6937_s0 + $0x80] sm:$0xff]   ;;  %v5324_v35 = vld [vmem:[#allocation2 + $0xa8] sm:$0xff]  }
  0x6b   :  { %v1906_v23 = vrot.slane %v1904_v16, 2  ;;  %v1913_v24 = vshll.u32 %v5775_v19, 16  ;;  %v1928_v16 = vshrl.u32 %v5804_v39, 16 }
  0x6c   :  { %v1881_v7 = vsel %vm1864_vm4, %v1872_v62, %v1880_v63  ;;  %v1533_v62 = vsel %vm1055_vm2, %v1530_v33, %v1532_v38 }
  0x6f   :  { %4918 = vmatmul.mubr.msk.bf16.gmra.mxu1 %vm195_vm0, %v718_v40  ;;  %4958 = vmatmul.mubr.msk.bf16.gmra.mxu0 %vm195_vm0, %v1080_v41  ;;  %v2349_v40 = vrot.slane %v5775_v19, 2  ;;  %v2351_v41 = vrot.slane %v5789_v30, 2  ;;  %v5331_v19 = vld [vmem:[#allocation2 + $0xc0] sm:$0xff]  }
  0x70   :  { %4921 = vmatprep.mubr.msk.bf16.mxu1 %vm195_vm0, %v726_v44  ;;  %4961 = vmatprep.mubr.msk.bf16.mxu0 %vm195_vm0, %v1082_v45  ;;  %v1525_v44 = vsel %vm1055_vm2, %v1523_v6, %v1524_v3  ;;  %v1895_v45 = vshll.u32 %v5742_v59, 16  ;;  %v1903_v3 = vrot.slane %v1901_v58, 1 }
  0x71   :  { %v5824_v50 = vsel %vm2339_vm3, %v2347_v36, %v2349_v40  ;;  %v5827_v51 = vsel %vm2339_vm3, %v2349_v40, %v2351_v41  ;;  %v5847_v61 = vsel %vm2339_vm3, %v2351_v41, %v2353_v53  ;;  %v2367_v36 = vrot.slane %v5909_v8, 2 }
  0x72   :  { %v1897_v17 = vrot.slane %v1895_v45, 2  ;;  %v2369_v40 = vrot.slane %v5917_v25, 2  ;;  %v1912_v41 = vrot.slane %v1910_v55, 1  ;;  %v1535_v55 = vsel %vm1055_vm2, %v1532_v38, %v1534_v11 }
  0x74   :  { %v1898_v34 = vor.u32 %v1897_v17, %v1894_v49  ;;  %v2371_v49 = vrot.slane %v5924_v29, 2  ;;  %v5948_v58 = vsel %vm2339_vm3, %v2367_v36, %v2369_v40  ;;  %v5325_v17 = vld [vmem:[#allocation2 + $0xc8] sm:$0xff]  }
  0x76   :  { %v5961_v59 = vsel %vm2339_vm3, %v2369_v40, %v2371_v49  ;;  %v6004_v40 = vld [vmem:[%s6937_s0 + $0x14] sm:$0xf] }
  0x77   :  { %4922 = vmatmul.mubr.msk.bf16.gmra.mxu1 %vm195_vm0, %v734_v60  ;;  %4962 = vmatmul.mubr.msk.bf16.gmra.mxu0 %vm195_vm0, %v1084_v56  ;;  %v2355_v56 = vrot.slane %v5818_v46, 2  ;;  %v5844_v60 = vld [vmem:[%s6937_s0 + $0x58] sm:$0xff]  }
  0x78   :  { %4925 = vmatprep.mubr.msk.bf16.mxu1 %vm195_vm0, %v742_v0  ;;  %4965 = vmatprep.mubr.msk.bf16.mxu0 %vm195_vm0, %v1086_v1  ;;  %v5854_v0 = vld [vmem:[%s6937_s0 + $0x60] sm:$0xff]   ;;  %v2359_v6 = vrot.slane %v5844_v60, 2 }
  0x79   :  { %v5857_v1 = vsel %vm2339_vm3, %v2353_v53, %v2355_v56  ;;  %v5873_v12 = vsel %vm2339_vm3, %v2355_v56, %v2357_v4  ;;  %v2361_v13 = vrot.slane %v5854_v0, 2  ;;  %v1531_v53 = vsel %vm1055_vm2, %v1528_v9, %v1530_v33 }
  0x7a   :  { %v5883_v43 = vsel %vm2339_vm3, %v2357_v4, %v2359_v6  ;;  %v1890_v56 = vsel %vm1864_vm4, %v1880_v63, %v1889_v22  ;;  %v1915_v4 = vrot.slane %v1913_v24, 2  ;;  %v1899_v9 = vsel %vm1864_vm4, %v1889_v22, %v1898_v34 }
  0x7b   :  { %v5893_v52 = vsel %vm2339_vm3, %v2359_v6, %v2361_v13  ;;  %v5901_v21 = vsel %vm2339_vm3, %v2361_v13, %v2363_v28  ;;  %v5958_v6 = vld [vmem:[%s6937_s0 + $0x98] ss:$0 sps:$4 sm:$0x33]   ;;  %v1922_v63 = vshll.u32 %v5789_v30, 16  ;;  %v1907_v13 = vor.u32 %v1906_v23, %v1903_v3 }
  0x7c   :  { %v2375_v33 = vrot.slane %v5958_v6, 2  ;;  %v1930_v24 = vrot.slane %v1928_v16, 1 }
  0x7d   :  { %v1924_v3 = vrot.slane %v1922_v63, 2  ;;  %v1908_v22 = vsel %vm1864_vm4, %v1898_v34, %v1907_v13  ;;  %v1940_v34 = vshll.u32 %v5818_v46, 16 }
  0x7f   :  { %4926 = vmatmul.mubr.msk.bf16.gmra.mxu1 %vm195_vm0, %v750_v37  ;;  %4966 = vmatmul.mubr.msk.bf16.gmra.mxu0 %vm195_vm0, %v1088_v27  ;;  %v2365_v27 = vrot.slane %v5898_v20, 2 }
  0x80   :  { %4969 = vmatprep.mubr.msk.bf16.mxu0 %vm195_vm0, %v1090_v42  ;;  %4981 = vmatprep.mubr.msk.bf16.mxu1 %vm195_vm0, %v1525_v44  ;;  %v1919_v42 = vshrl.u32 %v5789_v30, 16  ;;  %v5319_v44 = vld [vmem:[#allocation2 + $0xd0] sm:$0xff]   ;;  %v1540_v30 = vrot.slane %v5835_v54, 1 }
  0x81   :  { %v5928_v37 = vsel %vm2339_vm3, %v2363_v28, %v2365_v27  ;;  %v5938_v45 = vsel %vm2339_vm3, %v2365_v27, %v2367_v36  ;;  %v5991_v36 = vld [vmem:[#allocation2 + $0xf8] sm:$0xff]  }
  0x87   :  { %4970 = vmatmul.mubr.msk.bf16.gmra.mxu0 %vm195_vm0, %v1092_v10  ;;  %4982 = vmatmul.mubr.msk.bf16.vlgmr.msra.gmra.mxu1 %vm195_vm0, %v1527_v14  ;;  %v1536_v14 = vrot.slane %v5804_v39, 1 }
  0x88   :  { %4985 = vmatprep.mubr.msk.bf16.mxu1 %vm195_vm0, %v1529_v2  ;;  %5025 = vmatprep.mubr.msk.bf16.mxu0 %vm195_vm0, %v1881_v7  ;;  %v1916_v2 = vor.u32 %v1915_v4, %v1912_v41  ;;  %v1931_v7 = vshll.u32 %v5804_v39, 16  ;;  %v3610_v41 = vld [vmem:[%s6937_s0 + $0x10] sm:$0x8]  ;;  %v6024_v4 = vld [vmem:[#allocation2 + $0x118] sm:$0xff]  }
  0x89   :  { %5062 = vmatpush3.bf16.msra.mxu1 %v5623_v48  ;;  %v5935_v48 = vld [vmem:[%s6937_s0 + $0x90] sm:$0xff]   ;;  %v1537_v39 = vsel %vm1055_vm2, %v1534_v11, %v1536_v14  ;;  %v1937_v11 = vshrl.u32 %v5818_v46, 16 }
  0x8a   :  { %5063 = vmatprep.subr.bf16.mxu1 %v5318_v18  ;;  %v2373_v10 = vrot.slane %v5935_v48, 2  ;;  %v1917_v23 = vsel %vm1864_vm4, %v1907_v13, %v1916_v2  ;;  %v1933_v27 = vrot.slane %v1931_v7, 2 }
  0x8c   :  { %v5974_v28 = vsel %vm2339_vm3, %v2371_v49, %v2373_v10  ;;  %v1949_v49 = vshll.u32 %v5835_v54, 16 }
  0x8d   :  { %5064 = vmatpush3.bf16.msra.mxu1 %v5318_v18  ;;  %v5979_v18 = vsel %vm2339_vm3, %v2373_v10, %v2375_v33  ;;  %v1942_v33 = vrot.slane %v1940_v34, 2 }
  0x8e   :  { %5065 = vmatprep.subr.bf16.mxu1 %v5324_v35  ;;  %v1951_v7 = vrot.slane %v1949_v49, 2 }
  0x8f   :  { %4986 = vmatmul.mubr.msk.bf16.gmra.mxu1 %vm195_vm0, %v1531_v53  ;;  %5026 = vmatmul.mubr.msk.bf16.vlgmr.msra.gmra.mxu0 %vm195_vm0, %v1890_v56  ;;  %v4441_v53 = vcombine.low %v3610_v41, %v6004_v40 }
  0x90   :  { %5106 = vmatpush3.bf16.msra.mxu0 %v5634_v57  ;;  %4989 = vmatprep.mubr.msk.bf16.mxu1 %vm195_vm0, %v1533_v62  ;;  %v1921_v57 = vrot.slane %v1919_v42, 1  ;;  %v1934_v42 = vor.u32 %v1933_v27, %v1930_v24  ;;  %v6022_v62 = vld [vmem:[%s6937_s0 + $0x20] sm:$0xff]   ;;  %v1964_v24 = vshrl.u32 %v5854_v0, 16  ;;  %v1967_v27 = vshll.u32 %v5854_v0, 16 }
  0x91   :  { %5029 = vmatprep.mubr.msk.bf16.mxu0 %vm195_vm0, %v1899_v9  ;;  %5107 = vmatprep.subr.bf16.mxu0 %v5319_v44  ;;  %v3624_v63 = vrot.slane %v4441_v53, 3  ;;  %v3627_v13 = vrot.slane %v6022_v62, 3 }
  0x92   :  { %5066 = vmatpush3.bf16.msra.mxu1 %v5324_v35  ;;  %v1538_v35 = vrot.slane %v5818_v46, 1  ;;  %v1925_v38 = vor.u32 %v1924_v3, %v1921_v57  ;;  %v6015_v46 = vld [vmem:[%s6937_s0 + $0x18] sm:$0xff]   ;;  %v1542_v57 = vrot.slane %v5844_v60, 1  ;;  %v1544_v3 = vrot.slane %v5854_v0, 1 }
  0x93   :  { %5067 = vmatprep.subr.bf16.mxu1 %v5330_v15  ;;  %v3625_v10 = vrot.slane %v6015_v46, 3  ;;  %v1966_v53 = vrot.slane %v1964_v24, 1 }
  0x94   :  { %5108 = vmatpush3.bf16.msra.mxu0 %v5319_v44  ;;  %v1946_v44 = vshrl.u32 %v5835_v54, 16  ;;  %v1539_v56 = vsel %vm1055_vm2, %v1536_v14, %v1538_v35  ;;  %v1926_v54 = vsel %vm1864_vm4, %v1916_v2, %v1925_v38  ;;  %v1541_v9 = vsel %vm1055_vm2, %v1538_v35, %v1540_v30  ;;  %v6051_v35 = vld [vmem:[%s6937_s0 + $0x28] sm:$0xff]  }
  0x95   :  { %5109 = vmatprep.subr.bf16.mxu0 %v5325_v17  ;;  %v1935_v14 = vsel %vm1864_vm4, %v1925_v38, %v1934_v42  ;;  %v6036_v2 = vsel %vm3623_vm5, %v3625_v10, %v3627_v13  ;;  %v1543_v38 = vsel %vm1055_vm2, %v1540_v30, %v1542_v57  ;;  %v1546_v30 = vrot.slane %v5863_v5, 1 }
  0x96   :  { %5068 = vmatpush3.bf16.msra.mxu1 %v5330_v15  ;;  %v1939_v15 = vrot.slane %v1937_v11, 1  ;;  %v1948_v16 = vrot.slane %v1946_v44, 1  ;;  %v1545_v11 = vsel %vm1055_vm2, %v1542_v57, %v1544_v3 }
  0x97   :  { %4990 = vmatmul.mubr.msk.bf16.gmra.mxu1 %vm195_vm0, %v1535_v55  ;;  %5030 = vmatmul.mubr.msk.bf16.gmra.mxu0 %vm195_vm0, %v1908_v22  ;;  %v1955_v22 = vshrl.u32 %v5844_v60, 16  ;;  %v1547_v57 = vsel %vm1055_vm2, %v1544_v3, %v1546_v30  ;;  %v1550_v3 = vrot.slane %v5909_v8, 1 }
  0x98   :  { %4993 = vmatprep.mubr.msk.bf16.mxu1 %vm195_vm0, %v1537_v39  ;;  %5033 = vmatprep.mubr.msk.bf16.mxu0 %vm195_vm0, %v1917_v23  ;;  %v1943_v55 = vor.u32 %v1942_v33, %v1939_v15  ;;  %v1958_v39 = vshll.u32 %v5844_v60, 16  ;;  %v1952_v23 = vor.u32 %v1951_v7, %v1948_v16  ;;  %v3629_v60 = vrot.slane %v6051_v35, 3  ;;  %v6083_v16 = vld [vmem:[%s6937_s0 + $0x38] sm:$0xff]   ;;  %v6088_v7 = vld [vmem:[%s6937_s0 + $0x40] sm:$0xff]  }
  0x99   :  { %5110 = vmatpush3.bf16.msra.mxu0 %v5325_v17  ;;  %5149 = vmatprep.subr.bf16.mxu1 %v5991_v36  ;;  %v6032_v17 = vsel %vm3623_vm5, %v3624_v63, %v3625_v10  ;;  %v1957_v41 = vrot.slane %v1955_v22, 1  ;;  %v1548_v10 = vrot.slane %v5898_v20, 1  ;;  %v1976_v15 = vshll.u32 %v5863_v5, 16 }
  0x9a   :  { %5111 = vmatprep.subr.bf16.mxu0 %v5331_v19  ;;  %v1944_v34 = vsel %vm1864_vm4, %v1934_v42, %v1943_v55  ;;  %v1960_v0 = vrot.slane %v1958_v39, 2  ;;  %v1953_v49 = vsel %vm1864_vm4, %v1943_v55, %v1952_v23  ;;  %v1973_v42 = vshrl.u32 %v5863_v5, 16 }
  0x9b   :  { %v3633_v5 = vrot.slane %v6083_v16, 3  ;;  %v1549_v39 = vsel %vm1055_vm2, %v1546_v30, %v1548_v10  ;;  %v3635_v24 = vrot.slane %v6088_v7, 3  ;;  %v6115_v30 = vld [vmem:[%s6937_s0 + $0x48] sm:$0xff]  }
  0x9c   :  { %v1961_v63 = vor.u32 %v1960_v0, %v1957_v41  ;;  %v1975_v55 = vrot.slane %v1973_v42, 1  ;;  %v1991_v0 = vshrl.u32 %v5909_v8, 16  ;;  %v6120_v42 = vld [vmem:[%s6937_s0 + $0x50] sm:$0xff]  }
  0x9d   :  { %5112 = vmatpush3.bf16.msra.mxu0 %v5331_v19  ;;  %v6056_v19 = vld [vmem:[%s6937_s0 + $0x30] sm:$0xff]  }
  0x9e   :  { %5193 = vmatprep.subr.bf16.mxu0 %v6024_v4  ;;  %v3631_v44 = vrot.slane %v6056_v19, 3  ;;  %v1962_v22 = vsel %vm1864_vm4, %v1952_v23, %v1961_v63  ;;  %v1552_v23 = vrot.slane %v5917_v25, 1 }
  0x9f   :  { %4994 = vmatmul.mubr.msk.bf16.gmra.mxu1 %vm195_vm0, %v1539_v56  ;;  %5034 = vmatmul.mubr.msk.bf16.gmra.mxu0 %vm195_vm0, %v1926_v54  ;;  %v1969_v56 = vrot.slane %v1967_v27, 2  ;;  %v6065_v54 = vsel %vm3623_vm5, %v3627_v13, %v3629_v60  ;;  %v1982_v13 = vshrl.u32 %v5898_v20, 16 }
  0xa0   :  { %4997 = vmatprep.mubr.msk.bf16.mxu1 %vm195_vm0, %v1541_v9  ;;  %5037 = vmatprep.mubr.msk.bf16.mxu0 %vm195_vm0, %v1935_v14  ;;  %v6068_v9 = vsel %vm3623_vm5, %v3629_v60, %v3631_v44  ;;  %v1985_v14 = vshll.u32 %v5898_v20, 16  ;;  %v1978_v20 = vrot.slane %v1976_v15, 2  ;;  %v6097_v60 = vsel %vm3623_vm5, %v3631_v44, %v3633_v5 }
  0xa1   :  { %v1970_v33 = vor.u32 %v1969_v56, %v1966_v53  ;;  %v1994_v44 = vshll.u32 %v5909_v8, 16  ;;  %v2000_v53 = vshrl.u32 %v5917_v25, 16  ;;  %v2003_v56 = vshll.u32 %v5917_v25, 16 }
  0xa2   :  { %v1979_v41 = vor.u32 %v1978_v20, %v1975_v55  ;;  %v1553_v15 = vsel %vm1055_vm2, %v1550_v3, %v1552_v23  ;;  %v3637_v8 = vrot.slane %v6115_v30, 3 }
  0xa3   :  { %v1971_v27 = vsel %vm1864_vm4, %v1961_v63, %v1970_v33  ;;  %v1551_v63 = vsel %vm1055_vm2, %v1548_v10, %v1550_v3  ;;  %v1996_v25 = vrot.slane %v1994_v44, 2  ;;  %v1554_v10 = vrot.slane %v5924_v29, 1  ;;  %v6152_v44 = vld [vmem:[%s6937_s0 + $0x60] sm:$0xff]  }
  0xa4   :  { %v2018_v3 = vshrl.u32 %v5935_v48, 16 }
  0xa7   :  { %4998 = vmatmul.mubr.msk.bf16.gmra.mxu1 %vm195_vm0, %v1543_v38  ;;  %5038 = vmatmul.mubr.msk.bf16.gmra.mxu0 %vm195_vm0, %v1944_v34  ;;  %v1984_v38 = vrot.slane %v1982_v13, 1  ;;  %v6100_v34 = vsel %vm3623_vm5, %v3633_v5, %v3635_v24  ;;  %v1980_v13 = vsel %vm1864_vm4, %v1970_v33, %v1979_v41  ;;  %v2002_v5 = vrot.slane %v2000_v53, 1 }
  0xa8   :  { %5001 = vmatprep.mubr.msk.bf16.mxu1 %vm195_vm0, %v1545_v11  ;;  %5041 = vmatprep.mubr.msk.bf16.mxu0 %vm195_vm0, %v1953_v49  ;;  %v1987_v11 = vrot.slane %v1985_v14, 2  ;;  %6952 = vst [vmem:[#allocation8_spill] sm:$0xff] %v6100_v34  ;;  %v1993_v14 = vrot.slane %v1991_v0, 1  ;;  %v1556_v33 = vrot.slane %v5935_v48, 1  ;;  %v6147_v0 = vld [vmem:[%s6937_s0 + $0x58] sm:$0xff]   ;;  %v1555_v53 = vsel %vm1055_vm2, %v1552_v23, %v1554_v10 }
  0xa9   :  { %v3167_v34 = vshrl.u32 %v6022_v62, 16 }
  0xaa   :  { %v1988_v49 = vor.u32 %v1987_v11, %v1984_v38  ;;  %v2009_v38 = vshrl.u32 %v5924_v29, 16 }
  0xac   :  { %v1989_v55 = vsel %vm1864_vm4, %v1979_v41, %v1988_v49  ;;  %v2021_v41 = vshll.u32 %v5935_v48, 16  ;;  %v3641_v48 = vrot.slane %v6147_v0, 3 }
  0xaf   :  { %5002 = vmatmul.mubr.msk.bf16.gmra.mxu1 %vm195_vm0, %v1547_v57  ;;  %5042 = vmatmul.mubr.msk.bf16.gmra.mxu0 %vm195_vm0, %v1962_v22  ;;  %v3639_v57 = vrot.slane %v6120_v42, 3  ;;  %v2005_v22 = vrot.slane %v2003_v56, 2  ;;  %v1557_v56 = vsel %vm1055_vm2, %v1554_v10, %v1556_v33  ;;  %v2027_v10 = vshrl.u32 %v5958_v6, 16 }
  0xb0   :  { %5005 = vmatprep.mubr.msk.bf16.mxu1 %vm195_vm0, %v1549_v39  ;;  %5045 = vmatprep.mubr.msk.bf16.mxu0 %vm195_vm0, %v1971_v27  ;;  %v6129_v39 = vsel %vm3623_vm5, %v3635_v24, %v3637_v8  ;;  %v1997_v27 = vor.u32 %v1996_v25, %v1993_v14  ;;  %v2012_v24 = vshll.u32 %v5924_v29, 16  ;;  %v5333_v29 = vld [vmem:[%s6937_s0 + $0x98] ss:$0 sps:$4 sm:$0x11]   ;;  %v2020_v25 = vrot.slane %v2018_v3, 1  ;;  %v6186_v3 = vld [vmem:[%s6937_s0 + $0x70] sm:$0xff]  }
  0xb1   :  { %6953 = vst [vmem:[#allocation9_spill] sm:$0xff] %v6129_v39  ;;  %v6132_v20 = vsel %vm3623_vm5, %v3637_v8, %v3639_v57  ;;  %v2006_v11 = vor.u32 %v2005_v22, %v2002_v5  ;;  %v6164_v23 = vsel %vm3623_vm5, %v3639_v57, %v3641_v48  ;;  %v1558_v22 = vrot.slane %v5333_v29, 1  ;;  %v6178_v57 = vld [vmem:[%s6937_s0 + $0x68] sm:$0xff]   ;;  %6957 = vst [vmem:[#allocation13_spill] sm:$0xff] %v6186_v3 }
  0xb2   :  { %6954 = vst [vmem:[#allocation10_spill] sm:$0xff] %v6132_v20  ;;  %v2014_v8 = vrot.slane %v2012_v24, 2  ;;  %6955 = vst [vmem:[#allocation11_spill] sm:$0xff] %v6164_v23  ;;  %v2668_v24 = vld [vmem:[%s6937_s0 + $0x10] sm:$0xc] }
  0xb3   :  { %v2007_v14 = vsel %vm1864_vm4, %v1997_v27, %v2006_v11 }
  0xb7   :  { %5006 = vmatmul.mubr.msk.bf16.gmra.mxu1 %vm195_vm0, %v1551_v63  ;;  %5046 = vmatmul.mubr.msk.bf16.gmra.mxu0 %vm195_vm0, %v1980_v13  ;;  %v1998_v63 = vsel %vm1864_vm4, %v1988_v49, %v1997_v27  ;;  %v3643_v13 = vrot.slane %v6152_v44, 3  ;;  %v2030_v27 = vshll.u32 %v5958_v6, 16 }
  0xb8   :  { %5009 = vmatprep.mubr.msk.bf16.mxu1 %vm195_vm0, %v1553_v15  ;;  %5049 = vmatprep.mubr.msk.bf16.mxu0 %vm195_vm0, %v1989_v55  ;;  %v2011_v15 = vrot.slane %v2009_v38, 1  ;;  %v2023_v55 = vrot.slane %v2021_v41, 2  ;;  %v1559_v41 = vsel %vm1055_vm2, %v1556_v33, %v1558_v22 }
  0xb9   :  { %v6167_v5 = vsel %vm3623_vm5, %v3641_v48, %v3643_v13  ;;  %v2032_v29 = vrot.slane %v2030_v27, 2  ;;  %v3647_v48 = vrot.slane %v6186_v3, 3  ;;  %v5345_v27 = vld [vmem:[#allocation2 + $0xf0] sm:$0xff]  }
  0xba   :  { %6956 = vst [vmem:[#allocation12_spill] sm:$0xff] %v6167_v5  ;;  %v2015_v49 = vor.u32 %v2014_v8, %v2011_v15  ;;  %v2024_v38 = vor.u32 %v2023_v55, %v2020_v25  ;;  %v6194_v15 = vcombine.low %v2668_v24, %v6004_v40  ;;  %v2808_v40 = vrot.slane %v6015_v46, 2  ;;  %v6217_v25 = vld [vmem:[%s6937_s0 + $0x80] sm:$0xff]  }
  0xbb   :  { %6961 = vst [vmem:[#allocation17_spill] sm:$0xff] %v6217_v25 }
  0xbc   :  { %v2016_v6 = vsel %vm1864_vm4, %v2006_v11, %v2015_v49  ;;  %v2807_v11 = vrot.slane %v6194_v15, 2 }
  0xbf   :  { %5010 = vmatmul.mubr.msk.bf16.gmra.mxu1 %vm195_vm0, %v1555_v53  ;;  %5050 = vmatmul.mubr.msk.bf16.gmra.mxu0 %vm195_vm0, %v1998_v63  ;;  %v3645_v53 = vrot.slane %v6178_v57, 3  ;;  %v2025_v63 = vsel %vm1864_vm4, %v2015_v49, %v2024_v38  ;;  %v2809_v49 = vsel %vm2339_vm3, %v2807_v11, %v2808_v40  ;;  %v2818_v11 = vrot.slane %v6088_v7, 2 }
  0xc0   :  { %5013 = vmatprep.mubr.msk.bf16.mxu1 %vm195_vm0, %v1557_v56  ;;  %5053 = vmatprep.mubr.msk.bf16.mxu0 %vm195_vm0, %v2007_v14  ;;  %v2029_v56 = vrot.slane %v2027_v10, 1 }
  0xc1   :  { %v6197_v8 = vsel %vm3623_vm5, %v3643_v13, %v3645_v53  ;;  %v6200_v14 = vsel %vm3623_vm5, %v3645_v53, %v3647_v48  ;;  %v6212_v13 = vld [vmem:[%s6937_s0 + $0x78] sm:$0xff]   ;;  %v5351_v53 = vld [vmem:[#allocation2 + $0xe8] sm:$0xff]  }
  0xc2   :  { %6958 = vst [vmem:[#allocation14_spill] sm:$0xff] %v6197_v8  ;;  %6959 = vst [vmem:[#allocation15_spill] sm:$0xff] %v6200_v14  ;;  %v2033_v33 = vor.u32 %v2032_v29, %v2029_v56  ;;  %v3649_v55 = vrot.slane %v6212_v13, 3  ;;  %v5346_v56 = vld [vmem:[#allocation2 + $0x110] sm:$0xff]  }
  0xc3   :  { %6960 = vst [vmem:[#allocation16_spill] sm:$0xff] %v6212_v13 }
  0xc4   :  { %v2034_v22 = vsel %vm1864_vm4, %v2024_v38, %v2033_v33  ;;  %v6224_v10 = vsel %vm3623_vm5, %v3647_v48, %v3649_v55  ;;  %v2810_v38 = vrot.slane %v6022_v62, 2  ;;  %v5352_v48 = vld [vmem:[#allocation2 + $0x108] sm:$0xff]  }
  0xc5   :  { %6962 = vst [vmem:[#allocation18_spill] sm:$0xff] %v6224_v10 }
  0xc7   :  { %5014 = vmatmul.mubr.msk.bf16.gmra.mxu1 %vm195_vm0, %v1559_v41  ;;  %5054 = vmatmul.mubr.msk.bf16.gmra.mxu0 %vm195_vm0, %v2016_v6  ;;  %v2812_v41 = vrot.slane %v6051_v35, 2  ;;  %v2811_v6 = vsel %vm2339_vm3, %v2808_v40, %v2810_v38 }
  0xc8   :  { %5057 = vmatprep.mubr.msk.bf16.mxu0 %vm195_vm0, %v2025_v63  ;;  %5069 = vmatprep.mubr.msk.bf16.mxu1 %vm195_vm0, %v5782_v26  ;;  %v6941_v26 = vrot.slane %v6217_v25, 3 }
  0xc9   :  { %v2813_v29 = vsel %vm2339_vm3, %v2810_v38, %v2812_v41 }
  0xca   :  { %v6229_v24 = vsel %vm3623_vm5, %v3649_v55, %v6941_v26 }
  0xcb   :  { %6963 = vst [vmem:[#allocation19_spill] sm:$0xff] %v6229_v24 }
  0xcf   :  { %5058 = vmatmul.mubr.msk.bf16.gmra.mxu0 %vm195_vm0, %v2034_v22  ;;  %5070 = vmatmul.mubr.msk.bf16.vlgmr.msra.gmra.mxu1 %vm195_vm0, %v5792_v31  ;;  %v5357_v31 = vld [vmem:[#allocation2 + $0xe0] sm:$0xff]   ;;  %v2820_v22 = vrot.slane %v6115_v30, 2 }
  0xd0   :  { %5073 = vmatprep.mubr.msk.bf16.mxu1 %vm195_vm0, %v5795_v32  ;;  %5113 = vmatprep.mubr.msk.bf16.mxu0 %vm195_vm0, %v2809_v49  ;;  %v2814_v32 = vrot.slane %v6056_v19, 2 }
  0xd1   :  { %5150 = vmatpush3.bf16.msra.mxu1 %v5991_v36  ;;  %v2816_v36 = vrot.slane %v6083_v16, 2 }
  0xd2   :  { %5151 = vmatprep.subr.bf16.mxu1 %v5345_v27 }
  0xd3   :  { %v2817_v63 = vsel %vm2339_vm3, %v2814_v32, %v2816_v36 }
  0xd5   :  { %5152 = vmatpush3.bf16.msra.mxu1 %v5345_v27  ;;  %v2819_v27 = vsel %vm2339_vm3, %v2816_v36, %v2818_v11 }
  0xd6   :  { %5153 = vmatprep.subr.bf16.mxu1 %v5351_v53 }
  0xd7   :  { %5074 = vmatmul.mubr.msk.bf16.gmra.mxu1 %vm195_vm0, %v5821_v47  ;;  %5114 = vmatmul.mubr.msk.bf16.vlgmr.msra.gmra.mxu0 %vm195_vm0, %v2811_v6  ;;  %v2815_v47 = vsel %vm2339_vm3, %v2812_v41, %v2814_v32  ;;  %v2821_v41 = vsel %vm2339_vm3, %v2818_v11, %v2820_v22  ;;  %v2824_v32 = vrot.slane %v6147_v0, 2 }
  0xd8   :  { %5194 = vmatpush3.bf16.msra.mxu0 %v6024_v4  ;;  %5077 = vmatprep.mubr.msk.bf16.mxu1 %vm195_vm0, %v5824_v50  ;;  %v5358_v4 = vld [vmem:[#allocation2 + $0x100] sm:$0xff]  }
  0xd9   :  { %5117 = vmatprep.mubr.msk.bf16.mxu0 %vm195_vm0, %v2813_v29  ;;  %5195 = vmatprep.subr.bf16.mxu0 %v5346_v56 }
  0xda   :  { %5154 = vmatpush3.bf16.msra.mxu1 %v5351_v53 }
  0xdb   :  { %5155 = vmatprep.subr.bf16.mxu1 %v5357_v31 }
  0xdc   :  { %5196 = vmatpush3.bf16.msra.mxu0 %v5346_v56  ;;  %v2822_v56 = vrot.slane %v6120_v42, 2 }
  0xdd   :  { %5197 = vmatprep.subr.bf16.mxu0 %v5352_v48 }
  0xde   :  { %5156 = vmatpush3.bf16.msra.mxu1 %v5357_v31 }
  0xdf   :  { %v6253_v33 = vpop.f32.mrf.mxu0  ;;  %v6255_v50 = vpop.f32.mrf.mxu1  ;;  %5078 = vmatmul.mubr.msk.bf16.gmra.mxu1 %vm195_vm0, %v5827_v51  ;;  %5118 = vmatmul.mubr.msk.bf16.gmra.mxu0 %vm195_vm0, %v2815_v47 }
  0xe0   :  { %5081 = vmatprep.mubr.msk.bf16.mxu1 %vm195_vm0, %v5847_v61  ;;  %5121 = vmatprep.mubr.msk.bf16.mxu0 %vm195_vm0, %v2817_v63 }
  0xe1   :  { %v6264_v40 = vpop.f32.mrf.mxu0  ;;  %v6266_v55 = vpop.f32.mrf.mxu1  ;;  %5198 = vmatpush3.bf16.msra.mxu0 %v5352_v48 }
  0xe2   :  { %5199 = vmatprep.subr.bf16.mxu0 %v5358_v4 }
  0xe3   :  { %v6269_v49 = vpop.f32.mrf.mxu0  ;;  %v6271_v51 = vpop.f32.mrf.mxu1 }
  0xe5   :  { %v6274_v38 = vpop.f32.mrf.mxu0  ;;  %v6276_v61 = vpop.f32.mrf.mxu1  ;;  %5200 = vmatpush3.bf16.msra.mxu0 %v5358_v4 }
  0xe7   :  { %v6279_v53 = vpop.f32.mrf.mxu0  ;;  %v6281_v6 = vpop.f32.mrf.mxu1  ;;  %5082 = vmatmul.mubr.msk.bf16.gmra.mxu1 %vm195_vm0, %v5857_v1  ;;  %5122 = vmatmul.mubr.msk.bf16.gmra.mxu0 %vm195_vm0, %v2819_v27  ;;  %v2823_v1 = vsel %vm2339_vm3, %v2820_v22, %v2822_v56  ;;  %v2826_v22 = vrot.slane %v6152_v44, 2 }
  0xe8   :  { %5085 = vmatprep.mubr.msk.bf16.mxu1 %vm195_vm0, %v5873_v12  ;;  %5125 = vmatprep.mubr.msk.bf16.mxu0 %vm195_vm0, %v2821_v41  ;;  %v2825_v12 = vsel %vm2339_vm3, %v2822_v56, %v2824_v32  ;;  %v2828_v56 = vrot.slane %v6178_v57, 2 }
  0xe9   :  { %v6290_v29 = vpop.f32.mrf.mxu0  ;;  %v6292_v31 = vpop.f32.mrf.mxu1 }
  0xea   :  { %6964 = vst [vmem:[#allocation20_spill] sm:$0xff] %v6292_v31 }
  0xeb   :  { %v6295_v36 = vpop.f32.mrf.mxu0  ;;  %v6297_v48 = vpop.f32.mrf.mxu1 }
  0xec   :  { %6965 = vst [vmem:[#allocation21_spill] sm:$0xff] %v6297_v48 }
  0xed   :  { %v6300_v47 = vpop.f32.mrf.mxu0  ;;  %v6302_v63 = vpop.f32.mrf.mxu1 }
  0xee   :  { %6966 = vst [vmem:[#allocation22_spill] sm:$0xff] %v6302_v63  ;;  %v3158_v63 = vshrl.u32 %v6015_v46, 16 }
  0xef   :  { %v6305_v4 = vpop.f32.mrf.mxu0  ;;  %v6307_v11 = vpop.f32.mrf.mxu1  ;;  %5086 = vmatmul.mubr.msk.bf16.gmra.mxu1 %vm195_vm0, %v5883_v43  ;;  %5126 = vmatmul.mubr.msk.bf16.gmra.mxu0 %vm195_vm0, %v2823_v1  ;;  %v2827_v43 = vsel %vm2339_vm3, %v2824_v32, %v2826_v22 }
  0xf0   :  { %6967 = vst [vmem:[#allocation23_spill] sm:$0xff] %v6307_v11  ;;  %5089 = vmatprep.mubr.msk.bf16.mxu1 %vm195_vm0, %v5893_v52  ;;  %5129 = vmatprep.mubr.msk.bf16.mxu0 %vm195_vm0, %v2825_v12  ;;  %v2829_v52 = vsel %vm2339_vm3, %v2826_v22, %v2828_v56  ;;  %v6334_v12 = vld [vmem:[%s6939_s2] ss:$0 sm:$0xff]  ;;  %v2830_v22 = vrot.slane %v6186_v3, 2  ;;  %v3160_v31 = vrot.slane %v3158_v63, 2 }
  0xf1   :  { %v6316_v27 = vpop.f32.mrf.mxu0  ;;  %v6318_v41 = vpop.f32.mrf.mxu1  ;;  %v431_v63 = vadd.f32 %v6334_v12, %v6290_v29  ;;  %v434_v29 = vadd.f32 %v6295_v36, %v6334_v12 }
  0xf2   :  { %6968 = vst [vmem:[#allocation24_spill] sm:$0xff] %v6318_v41 }
  0xf3   :  { %v6321_v26 = vpop.f32.mrf.mxu0  ;;  %v6323_v24 = vpop.f32.mrf.mxu1 }
  0xf4   :  { %6969 = vst [vmem:[#allocation25_spill] sm:$0xff] %v6323_v24  ;;  %v2832_v24 = vrot.slane %v6212_v13, 2 }
  0xf5   :  { %v6326_v1 = vpop.f32.mrf.mxu0  ;;  %v6328_v10 = vpop.f32.mrf.mxu1 }
  0xf6   :  { %6970 = vst [vmem:[#allocation26_spill] sm:$0xff] %v6328_v10  ;;  %v2833_v20 = vsel %vm2339_vm3, %v2830_v22, %v2832_v24 }
  0xf7   :  { %v6336_v14 = vpop.f32.mrf.mxu0  ;;  %v4883_v8 = vpop.f32.mrf.mxu1  ;;  %5090 = vmatmul.mubr.msk.bf16.gmra.mxu1 %vm195_vm0, %v5901_v21  ;;  %5130 = vmatmul.mubr.msk.bf16.gmra.mxu0 %vm195_vm0, %v2827_v43 }
  0xf8   :  { %v6342_v32 = vadd.f32 %v4883_v8, %v6334_v12  ;;  %5093 = vmatprep.mubr.msk.bf16.mxu1 %vm195_vm0, %v5928_v37  ;;  %5133 = vmatprep.mubr.msk.bf16.mxu0 %vm195_vm0, %v2829_v52  ;;  %v2831_v37 = vsel %vm2339_vm3, %v2828_v56, %v2830_v22  ;;  %v6363_v52 = vld [vmem:[%s6937_s0 + $0x88] sm:$0xff]   ;;  %v427_v56 = vadd.f32 %v6334_v12, %v6264_v40  ;;  %v3161_v40 = vshll.u32 %v6015_v46, 16 }
  0xf9   :  { %v6348_v5 = vpop.f32.mrf.mxu0  ;;  %v412_v10 = vpop.f32.mrf.mxu1  ;;  %6974 = vst [vmem:[#allocation30_spill] sm:$0xff] %v6363_v52 }
  0xfa   :  { %6971 = vst [vmem:[#allocation27_spill] sm:$0xff] %v6342_v32  ;;  %v6352_v23 = vadd.f32 %v6334_v12, %v412_v10  ;;  %v429_v10 = vadd.f32 %v6253_v33, %v6334_v12  ;;  %v2834_v33 = vrot.slane %v6217_v25, 2  ;;  %v428_v25 = vadd.f32 %v6334_v12, %v6274_v38 }
  0xfb   :  { %v6354_v21 = vpop.f32.mrf.mxu0  ;;  %v4884_v43 = vpop.f32.mrf.mxu1  ;;  %v3163_v3 = vrot.slane %v3161_v40, 3  ;;  %v433_v38 = vadd.f32 %v6279_v53, %v6334_v12 }
  0xfc   :  { %6972 = vst [vmem:[#allocation28_spill] sm:$0xff] %v6352_v23  ;;  %v6357_v8 = vadd.f32 %v4884_v43, %v6334_v12  ;;  %v2835_v48 = vsel %vm2339_vm3, %v2832_v24, %v2834_v33 }
  0xfd   :  { %v6365_v32 = vpop.f32.mrf.mxu0  ;;  %v415_v41 = vpop.f32.mrf.mxu1 }
  0xfe   :  { %6973 = vst [vmem:[#allocation29_spill] sm:$0xff] %v6357_v8  ;;  %v6371_v23 = vadd.f32 %v6334_v12, %v415_v41  ;;  %v2836_v41 = vrot.slane %v6363_v52, 2  ;;  %v6398_v52 = vld [vmem:[%s6937_s0 + $0x90] sm:$0xff]  }
  0xff   :  { %v6373_v43 = vpop.f32.mrf.mxu0  ;;  %v4895_v8 = vpop.f32.mrf.mxu1  ;;  %5094 = vmatmul.mubr.msk.bf16.gmra.mxu1 %vm195_vm0, %v5938_v45  ;;  %5134 = vmatmul.mubr.msk.bf16.gmra.mxu0 %vm195_vm0, %v2831_v37  ;;  %v3150_v45 = vshrl.u32 %v6194_v15, 16  ;;  %v3153_v37 = vshll.u32 %v6194_v15, 16  ;;  %6976 = vst [vmem:[#allocation32_spill] sm:$0xff] %v6398_v52 }
 0x100   :  { %6975 = vst [vmem:[#allocation31_spill] sm:$0xff] %v6371_v23  ;;  %v1008_v11 = vadd.f32 %v4895_v8, %v429_v10  ;;  %5097 = vmatprep.mubr.msk.bf16.mxu1 %vm195_vm0, %v5948_v58  ;;  %5137 = vmatprep.mubr.msk.bf16.mxu0 %vm195_vm0, %v2833_v20  ;;  %v430_v58 = vadd.f32 %v6269_v49, %v6334_v12 }
 0x101   :  { %v6385_v22 = vpop.f32.mrf.mxu0  ;;  %v863_v23 = vpop.f32.mrf.mxu1  ;;  %v2837_v46 = vsel %vm2339_vm3, %v2834_v33, %v2836_v41  ;;  %v3152_v13 = vrot.slane %v3150_v45, 2  ;;  %v3155_v39 = vrot.slane %v3153_v37, 3  ;;  %v2838_v33 = vrot.slane %v6398_v52, 2 }
 0x102   :  { %v1006_v8 = vadd.f32 %v863_v23, %v427_v56  ;;  %v6407_v23 = vld [vmem:[%s6937_s0 + $0x98] sm:$0xff]   ;;  %v3170_v45 = vshll.u32 %v6022_v62, 16  ;;  %v3176_v52 = vshrl.u32 %v6051_v35, 16  ;;  %v3179_v62 = vshll.u32 %v6051_v35, 16 }
 0x103   :  { %v6393_v20 = vpop.f32.mrf.mxu0  ;;  %v4896_v10 = vpop.f32.mrf.mxu1 }
 0x104   :  { %v1009_v15 = vadd.f32 %v4896_v10, %v430_v58 }
 0x105   :  { %v6409_v49 = vpop.f32.mrf.mxu0  ;;  %v866_v56 = vpop.f32.mrf.mxu1 }
 0x106   :  { %v1007_v58 = vadd.f32 %v866_v56, %v428_v25  ;;  %v3164_v56 = vor.u32 %v3163_v3, %v3160_v31  ;;  %v432_v3 = vadd.f32 %v6334_v12, %v6300_v47  ;;  %v2839_v31 = vsel %vm2339_vm3, %v2836_v41, %v2838_v33 }
 0x107   :  { %v4899_v10 = vpop.f32.mrf.mxu1  ;;  %v4939_v24 = vpop.f32.mrf.mxu0  ;;  %5098 = vmatmul.mubr.msk.bf16.gmra.mxu1 %vm195_vm0, %v5961_v59  ;;  %5138 = vmatmul.mubr.msk.bf16.gmra.mxu0 %vm195_vm0, %v2835_v48  ;;  %v2840_v59 = vrot.slane %v6407_v23, 2  ;;  %v3156_v48 = vor.u32 %v3155_v39, %v3152_v13  ;;  %v3172_v39 = vrot.slane %v3170_v45, 3 }
 0x108   :  { %v1012_v37 = vadd.f32 %v4899_v10, %v433_v38  ;;  %v6421_v40 = vadd.f32 %v4939_v24, %v1008_v11  ;;  %5101 = vmatprep.mubr.msk.bf16.mxu1 %vm195_vm0, %v5974_v28  ;;  %5141 = vmatprep.mubr.msk.bf16.mxu0 %vm195_vm0, %v2837_v46  ;;  %v5362_v46 = vld [vmem:[%s6937_s0 + $0xa0] ss:$0 sps:$4 sm:$0x33]   ;;  %v3169_v24 = vrot.slane %v3167_v34, 2  ;;  %v437_v34 = vadd.f32 %v6305_v4, %v6334_v12 }
 0x109   :  { %v879_v25 = vpop.f32.mrf.mxu1  ;;  %v1205_v53 = vpop.f32.mrf.mxu0  ;;  %v2842_v41 = vrot.slane %v5362_v46, 2  ;;  %v3197_v46 = vshll.u32 %v6083_v16, 16 }
 0x10a   :  { %6977 = vst [vmem:[#allocation33_spill] sm:$0xff] %v6421_v40  ;;  %v1010_v11 = vadd.f32 %v879_v25, %v431_v63  ;;  %v6431_v38 = vadd.f32 %v1205_v53, %v1006_v8  ;;  %v2841_v63 = vsel %vm2339_vm3, %v2838_v33, %v2840_v59  ;;  %v3165_v25 = vsel %vm3148_vm6, %v3156_v48, %v3164_v56 }
 0x10b   :  { %v4900_v28 = vpop.f32.mrf.mxu1  ;;  %v4940_v10 = vpop.f32.mrf.mxu0  ;;  %v3178_v53 = vrot.slane %v3176_v52, 2  ;;  %v3185_v33 = vshrl.u32 %v6056_v19, 16  ;;  %v3188_v52 = vshll.u32 %v6056_v19, 16  ;;  %v435_v48 = vadd.f32 %v6334_v12, %v6316_v27 }
 0x10c   :  { %6978 = vst [vmem:[#allocation34_spill] sm:$0xff] %v6431_v38  ;;  %v1013_v13 = vadd.f32 %v4900_v28, %v434_v29  ;;  %v6438_v35 = vadd.f32 %v4940_v10, %v1009_v15  ;;  %v3181_v38 = vrot.slane %v3179_v62, 3  ;;  %v3173_v15 = vor.u32 %v3172_v39, %v3169_v24 }
 0x10d   :  { %v882_v36 = vpop.f32.mrf.mxu1  ;;  %v1208_v8 = vpop.f32.mrf.mxu0  ;;  %v3194_v10 = vshrl.u32 %v6083_v16, 16  ;;  %v438_v19 = vadd.f32 %v6321_v26, %v6334_v12 }
 0x10e   :  { %v1011_v45 = vadd.f32 %v882_v36, %v432_v3  ;;  %v6445_v40 = vadd.f32 %v1208_v8, %v1007_v58  ;;  %v3182_v28 = vor.u32 %v3181_v38, %v3178_v53  ;;  %v2843_v3 = vsel %vm2339_vm3, %v2840_v59, %v2842_v41 }
 0x10f   :  { %v4903_v47 = vpop.f32.mrf.mxu1  ;;  %v4943_v29 = vpop.f32.mrf.mxu0  ;;  %5102 = vmatmul.mubr.msk.bf16.gmra.mxu1 %vm195_vm0, %v5979_v18  ;;  %5142 = vmatmul.mubr.msk.bf16.gmra.mxu0 %vm195_vm0, %v2839_v31  ;;  %v3187_v31 = vrot.slane %v3185_v33, 2  ;;  %v3190_v36 = vrot.slane %v3188_v52, 3  ;;  %v436_v8 = vadd.f32 %v6334_v12, %v6326_v1  ;;  %v3174_v16 = vsel %vm3148_vm6, %v3164_v56, %v3173_v15 }
 0x110   :  { %v1016_v4 = vadd.f32 %v4903_v47, %v437_v34  ;;  %v6454_v62 = vadd.f32 %v4943_v29, %v1012_v37  ;;  %5145 = vmatprep.mubr.msk.bf16.mxu0 %vm195_vm0, %v2841_v63  ;;  %5157 = vmatprep.mubr.msk.bf16.mxu1 %vm195_vm0, %v3165_v25  ;;  %v3183_v26 = vsel %vm3148_vm6, %v3173_v15, %v3182_v28  ;;  %v3199_v34 = vrot.slane %v3197_v46, 3 }
 0x111   :  { %v895_v58 = vpop.f32.mrf.mxu1  ;;  %v1221_v18 = vpop.f32.mrf.mxu0  ;;  %v441_v47 = vadd.f32 %v6336_v14, %v6334_v12  ;;  %v3191_v1 = vor.u32 %v3190_v36, %v3187_v31  ;;  %v3203_v56 = vshrl.u32 %v6088_v7, 16  ;;  %v439_v15 = vadd.f32 %v6334_v12, %v6348_v5 }
 0x112   :  { %v1014_v24 = vadd.f32 %v895_v58, %v435_v48  ;;  %v6462_v39 = vadd.f32 %v1221_v18, %v1010_v11  ;;  %v3196_v11 = vrot.slane %v3194_v10, 2  ;;  %v3212_v18 = vshrl.u32 %v6115_v30, 16 }
 0x113   :  { %v4904_v27 = vpop.f32.mrf.mxu1  ;;  %v4944_v37 = vpop.f32.mrf.mxu0  ;;  %v3215_v10 = vshll.u32 %v6115_v30, 16  ;;  %v3192_v36 = vsel %vm3148_vm6, %v3182_v28, %v3191_v1  ;;  %v3221_v28 = vshrl.u32 %v6120_v42, 16 }
 0x114   :  { %v1017_v38 = vadd.f32 %v4904_v27, %v438_v19  ;;  %v6467_v63 = vadd.f32 %v4944_v37, %v1013_v13  ;;  %v3206_v13 = vshll.u32 %v6088_v7, 16  ;;  %v3200_v58 = vor.u32 %v3199_v34, %v3196_v11 }
 0x115   :  { %v898_v25 = vpop.f32.mrf.mxu1  ;;  %v1224_v53 = vpop.f32.mrf.mxu0  ;;  %v442_v7 = vadd.f32 %v6354_v21, %v6334_v12  ;;  %v3205_v27 = vrot.slane %v3203_v56, 2  ;;  %v3214_v21 = vrot.slane %v3212_v18, 2  ;;  %v3233_v56 = vshll.u32 %v6147_v0, 16 }
 0x116   :  { %v1015_v59 = vadd.f32 %v898_v25, %v436_v8  ;;  %v6473_v29 = vadd.f32 %v1224_v53, %v1011_v45  ;;  %v3208_v37 = vrot.slane %v3206_v13, 3  ;;  %v3217_v25 = vrot.slane %v3215_v10, 3 }
 0x117   :  { %v4907_v41 = vpop.f32.mrf.mxu1  ;;  %v4947_v33 = vpop.f32.mrf.mxu0  ;;  %5146 = vmatmul.mubr.msk.bf16.gmra.mxu0 %vm195_vm0, %v2843_v3  ;;  %5158 = vmatmul.mubr.msk.bf16.vlgmr.msra.gmra.mxu1 %vm195_vm0, %v3174_v16  ;;  %v3201_v16 = vsel %vm3148_vm6, %v3191_v1, %v3200_v58 }
 0x118   :  { %v1020_v52 = vadd.f32 %v4907_v41, %v441_v47  ;;  %v6481_v48 = vadd.f32 %v4947_v33, %v1016_v4  ;;  %5161 = vmatprep.mubr.msk.bf16.mxu1 %vm195_vm0, %v3183_v26  ;;  %5201 = vmatprep.mubr.msk.bf16.mxu0 %vm195_vm0, %v6032_v17  ;;  %v440_v17 = vadd.f32 %v6334_v12, %v6365_v32 }
 0x119   :  { %v911_v14 = vpop.f32.mrf.mxu1  ;;  %v1237_v45 = vpop.f32.mrf.mxu0  ;;  %v3209_v32 = vor.u32 %v3208_v37, %v3205_v27  ;;  %v443_v47 = vadd.f32 %v6334_v12, %v6385_v22  ;;  %v3218_v1 = vor.u32 %v3217_v25, %v3214_v21  ;;  %v3235_v27 = vrot.slane %v3233_v56, 3 }
 0x11a   :  { %v1018_v46 = vadd.f32 %v911_v14, %v439_v15  ;;  %v6490_v5 = vadd.f32 %v1237_v45, %v1014_v24  ;;  %v445_v24 = vadd.f32 %v6373_v43, %v6334_v12  ;;  %v3223_v14 = vrot.slane %v3221_v28, 2 }
 0x11b   :  { %v4908_v4 = vpop.f32.mrf.mxu1  ;;  %v4948_v19 = vpop.f32.mrf.mxu0 }
 0x11c   :  { %v1021_v3 = vadd.f32 %v4908_v4, %v442_v7  ;;  %v6494_v31 = vadd.f32 %v4948_v19, %v1017_v38  ;;  %v3224_v38 = vshll.u32 %v6120_v42, 16  ;;  %v446_v42 = vadd.f32 %v6393_v20, %v6334_v12 }
 0x11d   :  { %v914_v8 = vpop.f32.mrf.mxu1  ;;  %v1240_v30 = vpop.f32.mrf.mxu0  ;;  %v3210_v7 = vsel %vm3148_vm6, %v3200_v58, %v3209_v32  ;;  %v3219_v19 = vsel %vm3148_vm6, %v3209_v32, %v3218_v1  ;;  %v3239_v58 = vshrl.u32 %v6152_v44, 16 }
 0x11e   :  { %v1019_v53 = vadd.f32 %v914_v8, %v440_v17  ;;  %v6500_v26 = vadd.f32 %v1240_v30, %v1015_v59  ;;  %v3226_v45 = vrot.slane %v3224_v38, 3  ;;  %v447_v30 = vadd.f32 %v6334_v12, %v6266_v55 }
 0x11f   :  { %v4911_v11 = vpop.f32.mrf.mxu1  ;;  %v4951_v34 = vpop.f32.mrf.mxu0  ;;  %5162 = vmatmul.mubr.msk.bf16.gmra.mxu1 %vm195_vm0, %v3192_v36  ;;  %5202 = vmatmul.mubr.msk.bf16.vlgmr.msra.gmra.mxu0 %vm195_vm0, %v6036_v2  ;;  %v3230_v2 = vshrl.u32 %v6147_v0, 16  ;;  %v3241_v28 = vrot.slane %v3239_v58, 2 }
 0x120   :  { %v1024_v41 = vadd.f32 %v4911_v11, %v445_v24  ;;  %v6509_v43 = vadd.f32 %v4951_v34, %v1020_v52  ;;  %5165 = vmatprep.mubr.msk.bf16.mxu1 %vm195_vm0, %v3201_v16  ;;  %5205 = vmatprep.mubr.msk.bf16.mxu0 %vm195_vm0, %v6065_v54  ;;  %v444_v54 = vadd.f32 %v6334_v12, %v6409_v49 }
 0x121   :  { %v927_v59 = vpop.f32.mrf.mxu1  ;;  %v1253_v33 = vpop.f32.mrf.mxu0  ;;  %v3232_v20 = vrot.slane %v3230_v2, 2  ;;  %v3227_v49 = vor.u32 %v3226_v45, %v3223_v14  ;;  %v6980_v45 = vld [vmem:[#allocation13_spill] sm:$0xff] }
 0x122   :  { %v1022_v13 = vadd.f32 %v927_v59, %v443_v47  ;;  %v6518_v22 = vadd.f32 %v1253_v33, %v1018_v46  ;;  %v449_v46 = vadd.f32 %v6255_v50, %v6334_v12 }
 0x123   :  { %v4912_v15 = vpop.f32.mrf.mxu1  ;;  %v4952_v52 = vpop.f32.mrf.mxu0  ;;  %v3236_v24 = vor.u32 %v3235_v27, %v3232_v20  ;;  %v3228_v59 = vsel %vm3148_vm6, %v3218_v1, %v3227_v49 }
 0x124   :  { %v1025_v18 = vadd.f32 %v4912_v15, %v446_v42  ;;  %v6522_v10 = vadd.f32 %v4952_v52, %v1021_v3  ;;  %v3242_v3 = vshll.u32 %v6152_v44, 16  ;;  %v450_v44 = vadd.f32 %v6271_v51, %v6334_v12 }
 0x125   :  { %v930_v4 = vpop.f32.mrf.mxu1  ;;  %v1256_v0 = vpop.f32.mrf.mxu0  ;;  %v3237_v2 = vsel %vm3148_vm6, %v3227_v49, %v3236_v24  ;;  %v453_v42 = vadd.f32 %v6281_v6, %v6334_v12  ;;  %v6984_v49 = vld [vmem:[#allocation21_spill] sm:$0xff] }
 0x126   :  { %v1023_v37 = vadd.f32 %v930_v4, %v444_v54  ;;  %v6528_v17 = vadd.f32 %v1256_v0, %v1019_v53  ;;  %v3251_v53 = vshll.u32 %v6178_v57, 16  ;;  %v3244_v38 = vrot.slane %v3242_v3, 3 }
 0x127   :  { %v4915_v36 = vpop.f32.mrf.mxu1  ;;  %v4955_v8 = vpop.f32.mrf.mxu0  ;;  %5166 = vmatmul.mubr.msk.bf16.gmra.mxu1 %vm195_vm0, %v3210_v7  ;;  %5206 = vmatmul.mubr.msk.bf16.gmra.mxu0 %vm195_vm0, %v6068_v9  ;;  %v3248_v9 = vshrl.u32 %v6178_v57, 16  ;;  %v3257_v54 = vshrl.u32 %v6980_v45, 16  ;;  %v6981_v7 = vld [vmem:[#allocation20_spill] sm:$0xff]  ;;  %v454_v58 = vadd.f32 %v6984_v49, %v6334_v12 }
 0x128   :  { %v1028_v16 = vadd.f32 %v4915_v36, %v449_v46  ;;  %v6537_v50 = vadd.f32 %v4955_v8, %v1024_v41  ;;  %5169 = vmatprep.mubr.msk.bf16.mxu1 %vm195_vm0, %v3219_v19  ;;  %5209 = vmatprep.mubr.msk.bf16.mxu0 %vm195_vm0, %v6097_v60  ;;  %v448_v60 = vadd.f32 %v6334_v12, %v6276_v61  ;;  %v3253_v56 = vrot.slane %v3251_v53, 3  ;;  %v6979_v61 = vld [vmem:[#allocation8_spill] sm:$0xff]  ;;  %v6982_v19 = vld [vmem:[#allocation9_spill] sm:$0xff]  ;;  %v6985_v53 = vld [vmem:[#allocation22_spill] sm:$0xff] }
 0x129   :  { %v943_v21 = vpop.f32.mrf.mxu1  ;;  %v1269_v25 = vpop.f32.mrf.mxu0  ;;  %v3250_v51 = vrot.slane %v3248_v9, 2  ;;  %v3245_v1 = vor.u32 %v3244_v38, %v3241_v28  ;;  %v451_v4 = vadd.f32 %v6334_v12, %v6981_v7 }
 0x12a   :  { %v1026_v11 = vadd.f32 %v943_v21, %v447_v30  ;;  %v6546_v55 = vadd.f32 %v1269_v25, %v1022_v13  ;;  %v3259_v25 = vrot.slane %v3257_v54, 2 }
 0x12b   :  { %v4916_v34 = vpop.f32.mrf.mxu1  ;;  %v4956_v32 = vpop.f32.mrf.mxu0  ;;  %v3254_v46 = vor.u32 %v3253_v56, %v3250_v51  ;;  %v3246_v28 = vsel %vm3148_vm6, %v3236_v24, %v3245_v1 }
 0x12c   :  { %v1029_v47 = vadd.f32 %v4916_v34, %v450_v44  ;;  %v6550_v41 = vadd.f32 %v4956_v32, %v1025_v18  ;;  %v3260_v18 = vshll.u32 %v6980_v45, 16  ;;  %v452_v44 = vadd.f32 %v6334_v12, %v6985_v53  ;;  %v6989_v45 = vld [vmem:[#allocation24_spill] sm:$0xff]  ;;  %v6993_v53 = vld [vmem:[#allocation26_spill] sm:$0xff] }
 0x12d   :  { %v946_v33 = vpop.f32.mrf.mxu1  ;;  %v1272_v57 = vpop.f32.mrf.mxu0 }
 0x12e   :  { %v1027_v13 = vadd.f32 %v946_v33, %v448_v60  ;;  %v6556_v15 = vadd.f32 %v1272_v57, %v1023_v37  ;;  %v6983_v37 = vld [vmem:[#allocation16_spill] sm:$0xff]  ;;  %v3262_v9 = vrot.slane %v3260_v18, 3 }
 0x12f   :  { %v4919_v52 = vpop.f32.mrf.mxu1  ;;  %v4959_v14 = vpop.f32.mrf.mxu0  ;;  %5170 = vmatmul.mubr.msk.bf16.gmra.mxu1 %vm195_vm0, %v3228_v59  ;;  %5210 = vmatmul.mubr.msk.bf16.gmra.mxu0 %vm195_vm0, %v6979_v61  ;;  %v3266_v36 = vshrl.u32 %v6983_v37, 16  ;;  %v3269_v8 = vshll.u32 %v6983_v37, 16  ;;  %v3255_v59 = vsel %vm3148_vm6, %v3245_v1, %v3254_v46  ;;  %v455_v1 = vadd.f32 %v6334_v12, %v6989_v45  ;;  %v6996_v45 = vld [vmem:[#allocation27_spill] sm:$0xff] }
 0x130   :  { %v1032_v0 = vadd.f32 %v4919_v52, %v453_v42  ;;  %v6565_v6 = vadd.f32 %v4959_v14, %v1028_v16  ;;  %5173 = vmatprep.mubr.msk.bf16.mxu1 %vm195_vm0, %v3237_v2  ;;  %5213 = vmatprep.mubr.msk.bf16.mxu0 %vm195_vm0, %v6982_v19  ;;  %v3263_v24 = vor.u32 %v3262_v9, %v3259_v25  ;;  %v6988_v14 = vld [vmem:[#allocation17_spill] sm:$0xff] }
 0x131   :  { %v959_v20 = vpop.f32.mrf.mxu1  ;;  %v1285_v27 = vpop.f32.mrf.mxu0  ;;  %v3268_v33 = vrot.slane %v3266_v36, 2  ;;  %v3271_v57 = vrot.slane %v3269_v8, 3  ;;  %v3275_v61 = vshrl.u32 %v6988_v14, 16  ;;  %v3278_v7 = vshll.u32 %v6988_v14, 16  ;;  %v6992_v8 = vld [vmem:[#allocation25_spill] sm:$0xff] }
 0x132   :  { %v1030_v3 = vadd.f32 %v959_v20, %v451_v4  ;;  %v6574_v30 = vadd.f32 %v1285_v27, %v1026_v11  ;;  %v6986_v11 = vld [vmem:[#allocation23_spill] sm:$0xff]  ;;  %v6991_v27 = vld [vmem:[#allocation30_spill] sm:$0xff]  ;;  %v458_v49 = vadd.f32 %v6992_v8, %v6334_v12  ;;  %v3264_v25 = vsel %vm3148_vm6, %v3254_v46, %v3263_v24  ;;  %v6994_v46 = vld [vmem:[#allocation12_spill] sm:$0xff] }
 0x133   :  { %v4920_v16 = vpop.f32.mrf.mxu1  ;;  %v4960_v21 = vpop.f32.mrf.mxu0  ;;  %v457_v2 = vadd.f32 %v6986_v11, %v6334_v12  ;;  %v3272_v20 = vor.u32 %v3271_v57, %v3268_v33  ;;  %v3284_v37 = vshrl.u32 %v6991_v27, 16  ;;  %v3287_v36 = vshll.u32 %v6991_v27, 16  ;;  %v6998_v8 = vld [vmem:[#allocation28_spill] sm:$0xff] }
 0x134   :  { %v1033_v34 = vadd.f32 %v4920_v16, %v454_v58  ;;  %v6578_v32 = vadd.f32 %v4960_v21, %v1029_v47  ;;  %v6987_v47 = vld [vmem:[#allocation10_spill] sm:$0xff]  ;;  %v3277_v9 = vrot.slane %v3275_v61, 2 }
 0x135   :  { %v962_v38 = vpop.f32.mrf.mxu1  ;;  %v1288_v60 = vpop.f32.mrf.mxu0  ;;  %v3273_v57 = vsel %vm3148_vm6, %v3263_v24, %v3272_v20  ;;  %v3286_v11 = vrot.slane %v3284_v37, 2  ;;  %v6997_v24 = vld [vmem:[#allocation14_spill] sm:$0xff]  ;;  %v3302_v37 = vshrl.u32 %v6407_v23, 16 }
 0x136   :  { %v1031_v51 = vadd.f32 %v962_v38, %v452_v44  ;;  %v6584_v56 = vadd.f32 %v1288_v60, %v1027_v13  ;;  %v6990_v13 = vld [vmem:[#allocation11_spill] sm:$0xff]  ;;  %v456_v44 = vadd.f32 %v6334_v12, %v6993_v53  ;;  %v3280_v60 = vrot.slane %v3278_v7, 3  ;;  %v6995_v12 = vld [vmem:[#allocation32_spill] sm:$0xff] }
 0x137   :  { %v4923_v42 = vpop.f32.mrf.mxu1  ;;  %v4963_v52 = vpop.f32.mrf.mxu0  ;;  %5174 = vmatmul.mubr.msk.bf16.gmra.mxu1 %vm195_vm0, %v3246_v28  ;;  %5214 = vmatmul.mubr.msk.bf16.gmra.mxu0 %vm195_vm0, %v6987_v47  ;;  %v3296_v61 = vshll.u32 %v6995_v12, 16 }
 0x138   :  { %v1036_v54 = vadd.f32 %v4923_v42, %v457_v2  ;;  %v6592_v18 = vadd.f32 %v4963_v52, %v1032_v0  ;;  %5177 = vmatprep.mubr.msk.bf16.mxu1 %vm195_vm0, %v3255_v59  ;;  %5217 = vmatprep.mubr.msk.bf16.mxu0 %vm195_vm0, %v6990_v13  ;;  %v3289_v2 = vrot.slane %v3287_v36, 3  ;;  %v3305_v36 = vshll.u32 %v6407_v23, 16 }
 0x139   :  { %v975_v4 = vpop.f32.mrf.mxu1  ;;  %v1301_v19 = vpop.f32.mrf.mxu0  ;;  %v3298_v53 = vrot.slane %v3296_v61, 3 }
 0x13a   :  { %v1034_v58 = vadd.f32 %v975_v4, %v455_v1  ;;  %v6602_v0 = vadd.f32 %v1301_v19, %v1030_v3  ;;  %v3290_v19 = vor.u32 %v3289_v2, %v3286_v11  ;;  %v3304_v2 = vrot.slane %v3302_v37, 2 }
 0x13b   :  { %v4924_v16 = vpop.f32.mrf.mxu1  ;;  %v4964_v21 = vpop.f32.mrf.mxu0 }
 0x13c   :  { %v1037_v28 = vadd.f32 %v4924_v16, %v458_v49  ;;  %v6607_v38 = vadd.f32 %v4964_v21, %v1033_v34  ;;  %v3293_v34 = vshrl.u32 %v6995_v12, 16 }
 0x13d   :  { %v978_v59 = vpop.f32.mrf.mxu1  ;;  %v1304_v33 = vpop.f32.mrf.mxu0 }
 0x13e   :  { %v1035_v3 = vadd.f32 %v978_v59, %v456_v44  ;;  %v6610_v42 = vadd.f32 %v1304_v33, %v1031_v51  ;;  %v3281_v51 = vor.u32 %v3280_v60, %v3277_v9  ;;  %v6999_v44 = vld [vmem:[#allocation29_spill] sm:$0xff]  ;;  %v6635_v60 = vld [vmem:[%s6937_s0 + $0xa0] ss:$0 sps:$4 sm:$0x77]   ;;  %s5412_s0 = smov [#allocation5]  }
 0x13f   :  { %v4927_v52 = vpop.f32.mrf.mxu1  ;;  %v4967_v47 = vpop.f32.mrf.mxu0  ;;  %5178 = vmatmul.mubr.msk.bf16.gmra.mxu1 %vm195_vm0, %v3264_v25  ;;  %5218 = vmatmul.mubr.msk.bf16.gmra.mxu0 %vm195_vm0, %v6994_v46  ;;  %v3295_v25 = vrot.slane %v3293_v34, 2  ;;  %v3314_v37 = vshll.u32 %v6635_v60, 16  ;;  %s4173_s29 = sshll.u32 %s5412_s0, 4  ;;  %s4174_s29 = int_to_ptr.vmem [resolvable:$true] %s4173_s29 }
 0x140   :  { %v1040_v1 = vadd.f32 %v4927_v52, %v6996_v45  ;;  %v6618_v13 = vadd.f32 %v4967_v47, %v1036_v54  ;;  %5181 = vmatprep.mubr.msk.bf16.mxu1 %vm195_vm0, %v3273_v57  ;;  %5221 = vmatprep.mubr.msk.bf16.mxu0 %vm195_vm0, %v6997_v24  ;;  %v3282_v9 = vsel %vm3148_vm6, %v3272_v20, %v3281_v51  ;;  %v3307_v52 = vrot.slane %v3305_v36, 3  ;;  %v7000_v47 = vld [vmem:[#allocation31_spill] sm:$0xff]  ;;  %s5385_s30 = scalar_lea.vmem %s4174_s29, 2304  ;;  %p5390_p6 = scmp.lt.s32.totalorder %s4174_s29, %s4174_s29 }
 0x141   :  { %v991_v7 = vpop.f32.mrf.mxu1  ;;  %v1317_v4 = vpop.f32.mrf.mxu0  ;;  %v7001_v20 = vld [vmem:[#allocation15_spill] sm:$0xff]  ;;  %v3299_v45 = vor.u32 %v3298_v53, %v3295_v25  ;;  %p5386_p5 = scmp.ne.s32.totalorder %s4174_s29, %s5385_s30  ;;  %p5391_p7 = scmp.lt.s32.totalorder %s5385_s30, %s5385_s30 }
 0x142   :  { %v1038_v49 = vadd.f32 %v991_v7, %v6998_v8  ;;  %v6626_v16 = vadd.f32 %v1317_v4, %v1034_v58  ;;  %v3291_v58 = vsel %vm3148_vm6, %v3281_v51, %v3290_v19  ;;  %v7002_v7 = vld [vmem:[#allocation33_spill] sm:$0xff]  ;;  %v7003_v51 = vld [vmem:[#allocation18_spill] sm:$0xff] }
 0x143   :  { %v4928_v21 = vpop.f32.mrf.mxu1  ;;  %v4968_v54 = vpop.f32.mrf.mxu0  ;;  %p5392_p8 = por %p5391_p7, %p5390_p6 }
 0x144   :  { %v1041_v59 = vadd.f32 %v4928_v21, %v6999_v44  ;;  %v6629_v33 = vadd.f32 %v4968_v54, %v1037_v28  ;;  %v3308_v21 = vor.u32 %v3307_v52, %v3304_v2  ;;  %v3653_v54 = vrot.slane %v6991_v27, 3 }
 0x145   :  { %v994_v57 = vpop.f32.mrf.mxu1  ;;  %v1320_v11 = vpop.f32.mrf.mxu0  ;;  %v7005_v27 = vrot.slane %v6988_v14, 3  ;;  %p5393_p9 = pnand %p5392_p8, %p5386_p5 }
 0x146   :  { %v1039_v46 = vadd.f32 %v994_v57, %v7000_v47  ;;  %v6639_v34 = vadd.f32 %v1320_v11, %v1035_v3  ;;  %v3311_v3 = vshrl.u32 %v6635_v60, 16  ;;  %v3300_v57 = vsel %vm3148_vm6, %v3290_v19, %v3299_v45 }
 0x147   :  { %v4971_v61 = vpop.f32.mrf.mxu0  ;;  %v4983_v28 = vpop.f32.mrf.mxu1  ;;  %5182 = vmatmul.mubr.msk.bf16.gmra.mxu1 %vm195_vm0, %v3282_v9  ;;  %5222 = vmatmul.mubr.msk.bf16.gmra.mxu0 %vm195_vm0, %v7001_v20  ;;  %v3309_v2 = vsel %vm3148_vm6, %v3299_v45, %v3308_v21 }
 0x148   :  { %v6644_v24 = vadd.f32 %v4971_v61, %v1040_v1  ;;  %v1817_v4 = vadd.f32 %v4983_v28, %v7002_v7  ;;  %5185 = vmatprep.mubr.msk.bf16.mxu1 %vm195_vm0, %v3291_v58  ;;  %5225 = vmatprep.mubr.msk.bf16.mxu0 %vm195_vm0, %v7003_v51  ;;  %v7004_v1 = vld [vmem:[#allocation34_spill] sm:$0xff]  ;;  %v3313_v47 = vrot.slane %v3311_v3, 2  ;;  %v3316_v61 = vrot.slane %v3314_v37, 3 }
 0x149   :  { %v1333_v36 = vpop.f32.mrf.mxu0  ;;  %v1672_v8 = vpop.f32.mrf.mxu1  ;;  %v3657_v37 = vrot.slane %v6407_v23, 3 }
 0x14a   :  { %v6653_v44 = vadd.f32 %v1333_v36, %v1038_v49  ;;  %v1815_v25 = vadd.f32 %v1672_v8, %v7004_v1  ;;  %v3654_v49 = vsel %vm3623_vm5, %v7005_v27, %v3653_v54  ;;  %v3317_v14 = vor.u32 %v3316_v61, %v3313_v47 }
 0x14b   :  { %v4972_v53 = vpop.f32.mrf.mxu0  ;;  %v4984_v9 = vpop.f32.mrf.mxu1 }
 0x14c   :  { %v6657_v11 = vadd.f32 %v4972_v53, %v1041_v59  ;;  %v1818_v58 = vadd.f32 %v4984_v9, %v6438_v35  ;;  %v7006_v59 = vld [vmem:[#allocation19_spill] sm:$0xff]  ;;  %v3318_v9 = vsel %vm3148_vm6, %v3308_v21, %v3317_v14  ;;  %v3659_v21 = vrot.slane %v6635_v60, 3 }
 0x14d   :  { %v1336_v28 = vpop.f32.mrf.mxu0  ;;  %v1675_v20 = vpop.f32.mrf.mxu1 }
 0x14e   :  { %v6664_v52 = vadd.f32 %v1336_v28, %v1039_v46  ;;  %v1816_v7 = vadd.f32 %v1675_v20, %v6445_v40  ;;  %v3655_v46 = vrot.slane %v6995_v12, 3 }
 0x14f   :  { %v4987_v51 = vpop.f32.mrf.mxu1  ;;  %v5027_v19 = vpop.f32.mrf.mxu0  ;;  %5186 = vmatmul.mubr.msk.bf16.gmra.mxu1 %vm195_vm0, %v3300_v57  ;;  %5226 = vmatmul.mubr.msk.bf16.gmra.mxu0 %vm195_vm0, %v7006_v59 }
 0x150   :  { %v1821_v35 = vadd.f32 %v4987_v51, %v6454_v62  ;;  %v6671_v3 = vadd.f32 %v5027_v19, %v1817_v4  ;;  %5189 = vmatprep.mubr.msk.bf16.mxu1 %vm195_vm0, %v3309_v2  ;;  %5229 = vmatprep.mubr.msk.bf16.mxu0 %vm195_vm0, %v3654_v49  ;;  %v3656_v57 = vsel %vm3623_vm5, %v3653_v54, %v3655_v46 }
 0x151   :  { %v1688_v45 = vpop.f32.mrf.mxu1  ;;  %v2147_v40 = vpop.f32.mrf.mxu0  ;;  %v3658_v61 = vsel %vm3623_vm5, %v3655_v46, %v3657_v37 }
 0x152   :  { %v1819_v36 = vadd.f32 %v1688_v45, %v6462_v39  ;;  %v6678_v8 = vadd.f32 %v2147_v40, %v1815_v25 }
 0x153   :  { %v4988_v1 = vpop.f32.mrf.mxu1  ;;  %v5028_v53 = vpop.f32.mrf.mxu0 }
 0x154   :  { %v1822_v62 = vadd.f32 %v4988_v1, %v6467_v63  ;;  %v6681_v4 = vadd.f32 %v5028_v53, %v1818_v58 }
 0x155   :  { %v1691_v47 = vpop.f32.mrf.mxu1  ;;  %v2150_v12 = vpop.f32.mrf.mxu0 }
 0x156   :  { %v1820_v23 = vadd.f32 %v1691_v47, %v6473_v29  ;;  %v6687_v28 = vadd.f32 %v2150_v12, %v1816_v7 }
 0x157   :  { %v4991_v39 = vpop.f32.mrf.mxu1  ;;  %v5031_v25 = vpop.f32.mrf.mxu0  ;;  %5190 = vmatmul.mubr.msk.bf16.gmra.mxu1 %vm195_vm0, %v3318_v9  ;;  %5230 = vmatmul.mubr.msk.bf16.gmra.mxu0 %vm195_vm0, %v3656_v57 }
 0x158   :  { %v1825_v63 = vadd.f32 %v4991_v39, %v6481_v48  ;;  %v6692_v58 = vadd.f32 %v5031_v25, %v1821_v35  ;;  %5233 = vmatprep.mubr.msk.bf16.mxu0 %vm195_vm0, %v3658_v61  ;;  %v3660_v48 = vsel %vm3623_vm5, %v3657_v37, %v3659_v21 }
 0x159   :  { %v1704_v54 = vpop.f32.mrf.mxu1  ;;  %v2163_v20 = vpop.f32.mrf.mxu0 }
 0x15a   :  { %v1823_v29 = vadd.f32 %v1704_v54, %v6490_v5  ;;  %v6697_v2 = vadd.f32 %v2163_v20, %v1819_v36 }
 0x15b   :  { %v4992_v27 = vpop.f32.mrf.mxu1  ;;  %v5032_v49 = vpop.f32.mrf.mxu0 }
 0x15c   :  { %v1826_v7 = vadd.f32 %v4992_v27, %v6494_v31  ;;  %v6700_v51 = vadd.f32 %v5032_v49, %v1822_v62 }
 0x15d   :  { %v1707_v19 = vpop.f32.mrf.mxu1  ;;  %v2166_v59 = vpop.f32.mrf.mxu0 }
 0x15e   :  { %v1824_v35 = vadd.f32 %v1707_v19, %v6500_v26  ;;  %v6704_v14 = vadd.f32 %v2166_v59, %v1820_v23 }
 0x15f   :  { %v4995_v60 = vpop.f32.mrf.mxu1  ;;  %v5035_v46 = vpop.f32.mrf.mxu0  ;;  %5234 = vmatmul.mubr.msk.bf16.gmra.mxu0 %vm195_vm0, %v3660_v48 }
 0x160   :  { %v1829_v5 = vadd.f32 %v4995_v60, %v6509_v43  ;;  %v6708_v45 = vadd.f32 %v5035_v46, %v1825_v63 }
 0x161   :  { %v1720_v40 = vpop.f32.mrf.mxu1  ;;  %v2179_v31 = vpop.f32.mrf.mxu0 }
 0x162   :  { %v1827_v36 = vadd.f32 %v1720_v40, %v6518_v22  ;;  %v6711_v1 = vadd.f32 %v2179_v31, %v1823_v29 }
 0x163   :  { %v4996_v37 = vpop.f32.mrf.mxu1  ;;  %v5036_v53 = vpop.f32.mrf.mxu0 }
 0x164   :  { %v1830_v26 = vadd.f32 %v4996_v37, %v6522_v10  ;;  %v6714_v62 = vadd.f32 %v5036_v53, %v1826_v7 }
 0x165   :  { %v1723_v9 = vpop.f32.mrf.mxu1  ;;  %v2182_v57 = vpop.f32.mrf.mxu0 }
 0x166   :  { %v1828_v47 = vadd.f32 %v1723_v9, %v6528_v17  ;;  %v6717_v12 = vadd.f32 %v2182_v57, %v1824_v35 }
 0x167   :  { %v4999_v43 = vpop.f32.mrf.mxu1  ;;  %v5039_v61 = vpop.f32.mrf.mxu0 }
 0x168   :  { %v1833_v23 = vadd.f32 %v4999_v43, %v6537_v50  ;;  %v6720_v39 = vadd.f32 %v5039_v61, %v1829_v5 }
 0x169   :  { %v1736_v22 = vpop.f32.mrf.mxu1  ;;  %v2195_v25 = vpop.f32.mrf.mxu0 }
 0x16a   :  { %v1831_v63 = vadd.f32 %v1736_v22, %v6546_v55  ;;  %v6723_v21 = vadd.f32 %v2195_v25, %v1827_v36 }
 0x16b   :  { %v5000_v10 = vpop.f32.mrf.mxu1  ;;  %v5040_v54 = vpop.f32.mrf.mxu0 }
 0x16c   :  { %v1834_v20 = vadd.f32 %v5000_v10, %v6550_v41  ;;  %v6726_v29 = vadd.f32 %v5040_v54, %v1830_v26 }
 0x16d   :  { %v1739_v17 = vpop.f32.mrf.mxu1  ;;  %v2198_v27 = vpop.f32.mrf.mxu0 }
 0x16e   :  { %v1832_v49 = vadd.f32 %v1739_v17, %v6556_v15  ;;  %v6729_v7 = vadd.f32 %v2198_v27, %v1828_v47 }
 0x16f   :  { %v5003_v50 = vpop.f32.mrf.mxu1  ;;  %v5043_v48 = vpop.f32.mrf.mxu0 }
 0x170   :  { %v1837_v19 = vadd.f32 %v5003_v50, %v6565_v6  ;;  %v6732_v59 = vadd.f32 %v5043_v48, %v1833_v23 }
 0x171   :  { %v1752_v55 = vpop.f32.mrf.mxu1  ;;  %v2211_v35 = vpop.f32.mrf.mxu0 }
 0x172   :  { %v1835_v60 = vadd.f32 %v1752_v55, %v6574_v30  ;;  %v6735_v46 = vadd.f32 %v2211_v35, %v1831_v63 }
 0x173   :  { %v5004_v41 = vpop.f32.mrf.mxu1  ;;  %v5044_v5 = vpop.f32.mrf.mxu0 }
 0x174   :  { %v1838_v40 = vadd.f32 %v5004_v41, %v6578_v32  ;;  %v6738_v31 = vadd.f32 %v5044_v5, %v1834_v20 }
 0x175   :  { %v1755_v15 = vpop.f32.mrf.mxu1  ;;  %v2214_v36 = vpop.f32.mrf.mxu0 }
 0x176   :  { %v1836_v37 = vadd.f32 %v1755_v15, %v6584_v56  ;;  %v6741_v53 = vadd.f32 %v2214_v36, %v1832_v49 }
 0x177   :  { %v5007_v6 = vpop.f32.mrf.mxu1  ;;  %v5047_v26 = vpop.f32.mrf.mxu0 }
 0x178   :  { %v1841_v9 = vadd.f32 %v5007_v6, %v6592_v18  ;;  %v6744_v57 = vadd.f32 %v5047_v26, %v1837_v19 }
 0x179   :  { %v1768_v30 = vpop.f32.mrf.mxu1  ;;  %v2227_v47 = vpop.f32.mrf.mxu0 }
 0x17a   :  { %v1839_v43 = vadd.f32 %v1768_v30, %v6602_v0  ;;  %v6747_v61 = vadd.f32 %v2227_v47, %v1835_v60 }
 0x17b   :  { %v5008_v32 = vpop.f32.mrf.mxu1  ;;  %v5048_v23 = vpop.f32.mrf.mxu0 }
 0x17c   :  { %v1842_v22 = vadd.f32 %v5008_v32, %v6607_v38  ;;  %v6750_v25 = vadd.f32 %v5048_v23, %v1838_v40 }
 0x17d   :  { %v1771_v56 = vpop.f32.mrf.mxu1  ;;  %v2230_v63 = vpop.f32.mrf.mxu0 }
 0x17e   :  { %v1840_v10 = vadd.f32 %v1771_v56, %v6610_v42  ;;  %v6753_v54 = vadd.f32 %v2230_v63, %v1836_v37 }
 0x17f   :  { %v5011_v18 = vpop.f32.mrf.mxu1  ;;  %v5051_v20 = vpop.f32.mrf.mxu0 }
 0x180   :  { %v1845_v17 = vadd.f32 %v5011_v18, %v6618_v13  ;;  %v6756_v27 = vadd.f32 %v5051_v20, %v1841_v9 }
 0x181   :  { %v1784_v0 = vpop.f32.mrf.mxu1  ;;  %v2243_v49 = vpop.f32.mrf.mxu0 }
 0x182   :  { %v1843_v50 = vadd.f32 %v1784_v0, %v6626_v16  ;;  %v6759_v48 = vadd.f32 %v2243_v49, %v1839_v43 }
 0x183   :  { %v5012_v38 = vpop.f32.mrf.mxu1  ;;  %v5052_v19 = vpop.f32.mrf.mxu0 }
 0x184   :  { %v1846_v55 = vadd.f32 %v5012_v38, %v6629_v33  ;;  %v6762_v35 = vadd.f32 %v5052_v19, %v1842_v22 }
 0x185   :  { %v1787_v42 = vpop.f32.mrf.mxu1  ;;  %v2246_v60 = vpop.f32.mrf.mxu0 }
 0x186   :  { %v1844_v41 = vadd.f32 %v1787_v42, %v6639_v34  ;;  %v6765_v5 = vadd.f32 %v2246_v60, %v1840_v10 }
 0x187   :  { %v5015_v13 = vpop.f32.mrf.mxu1  ;;  %v5055_v40 = vpop.f32.mrf.mxu0 }
 0x188   :  { %v1849_v15 = vadd.f32 %v5015_v13, %v6644_v24  ;;  %v6768_v36 = vadd.f32 %v5055_v40, %v1845_v17 }
 0x189   :  { %v1800_v16 = vpop.f32.mrf.mxu1  ;;  %v2259_v37 = vpop.f32.mrf.mxu0 }
 0x18a   :  { %v1847_v6 = vadd.f32 %v1800_v16, %v6653_v44  ;;  %v6771_v26 = vadd.f32 %v2259_v37, %v1843_v50 }
 0x18b   :  { %v5016_v33 = vpop.f32.mrf.mxu1  ;;  %v5056_v9 = vpop.f32.mrf.mxu0 }
 0x18c   :  { %v1850_v30 = vadd.f32 %v5016_v33, %v6657_v11  ;;  %v6774_v47 = vadd.f32 %v5056_v9, %v1846_v55 }
 0x18d   :  { %v1803_v34 = vpop.f32.mrf.mxu1  ;;  %v2262_v43 = vpop.f32.mrf.mxu0 }
 0x18e   :  { %v1848_v32 = vadd.f32 %v1803_v34, %v6664_v52  ;;  %v6777_v23 = vadd.f32 %v2262_v43, %v1844_v41 }
 0x18f   :  { %v5059_v24 = vpop.f32.mrf.mxu0  ;;  %v5071_v22 = vpop.f32.mrf.mxu1 }
 0x190   :  { %v6779_v56 = vadd.f32 %v5059_v24, %v1849_v15  ;;  %v2634_v44 = vadd.f32 %v5071_v22, %v6671_v3 }
 0x191   :  { %v2275_v63 = vpop.f32.mrf.mxu0  ;;  %v2489_v10 = vpop.f32.mrf.mxu1 }
 0x192   :  { %v6782_v18 = vadd.f32 %v2275_v63, %v1847_v6  ;;  %v2632_v11 = vadd.f32 %v2489_v10, %v6678_v8 }
 0x193   :  { %v5060_v20 = vpop.f32.mrf.mxu0  ;;  %v5072_v17 = vpop.f32.mrf.mxu1 }
 0x194   :  { %v6785_v0 = vadd.f32 %v5060_v20, %v1850_v30  ;;  %v2635_v52 = vadd.f32 %v5072_v17, %v6681_v4 }
 0x195   :  { %v2278_v49 = vpop.f32.mrf.mxu0  ;;  %v2492_v50 = vpop.f32.mrf.mxu1 }
 0x196   :  { %v6788_v38 = vadd.f32 %v2278_v49, %v1848_v32  ;;  %v2633_v19 = vadd.f32 %v2492_v50, %v6687_v28 }
 0x197   :  { %v5075_v55 = vpop.f32.mrf.mxu1  ;;  %v5115_v3 = vpop.f32.mrf.mxu0 }
 0x198   :  { %v2638_v42 = vadd.f32 %v5075_v55, %v6692_v58  ;;  %v6792_v60 = vadd.f32 %v5115_v3, %v2634_v44 }
 0x199   :  { %v2505_v41 = vpop.f32.mrf.mxu1  ;;  %v2956_v8 = vpop.f32.mrf.mxu0 }
 0x19a   :  { %v2636_v13 = vadd.f32 %v2505_v41, %v6697_v2  ;;  %v6795_v40 = vadd.f32 %v2956_v8, %v2632_v11 }
 0x19b   :  { %v5076_v15 = vpop.f32.mrf.mxu1  ;;  %v5116_v4 = vpop.f32.mrf.mxu0 }
 0x19c   :  { %v2639_v16 = vadd.f32 %v5076_v15, %v6700_v51  ;;  %v6798_v37 = vadd.f32 %v5116_v4, %v2635_v52 }
 0x19d   :  { %v2508_v6 = vpop.f32.mrf.mxu1  ;;  %v2959_v28 = vpop.f32.mrf.mxu0 }
 0x19e   :  { %v2637_v33 = vadd.f32 %v2508_v6, %v6704_v14  ;;  %v6801_v9 = vadd.f32 %v2959_v28, %v2633_v19 }
 0x19f   :  { %v5079_v58 = vpop.f32.mrf.mxu1  ;;  %v5119_v30 = vpop.f32.mrf.mxu0 }
 0x1a0   :  { %v2642_v34 = vadd.f32 %v5079_v58, %v6708_v45  ;;  %v6804_v43 = vadd.f32 %v5119_v30, %v2638_v42 }
 0x1a1   :  { %v2521_v2 = vpop.f32.mrf.mxu1  ;;  %v2972_v32 = vpop.f32.mrf.mxu0 }
 0x1a2   :  { %v2640_v24 = vadd.f32 %v2521_v2, %v6711_v1  ;;  %v6807_v22 = vadd.f32 %v2972_v32, %v2636_v13 }
 0x1a3   :  { %v5080_v51 = vpop.f32.mrf.mxu1  ;;  %v5120_v44 = vpop.f32.mrf.mxu0 }
 0x1a4   :  { %v2643_v63 = vadd.f32 %v5080_v51, %v6714_v62  ;;  %v6810_v10 = vadd.f32 %v5120_v44, %v2639_v16 }
 0x1a5   :  { %v2524_v14 = vpop.f32.mrf.mxu1  ;;  %v2975_v11 = vpop.f32.mrf.mxu0 }
 0x1a6   :  { %v2641_v20 = vadd.f32 %v2524_v14, %v6717_v12  ;;  %v6813_v17 = vadd.f32 %v2975_v11, %v2637_v33 }
 0x1a7   :  { %v5083_v45 = vpop.f32.mrf.mxu1  ;;  %v5123_v52 = vpop.f32.mrf.mxu0 }
 0x1a8   :  { %v2646_v49 = vadd.f32 %v5083_v45, %v6720_v39  ;;  %v6816_v50 = vadd.f32 %v5123_v52, %v2642_v34 }
 0x1a9   :  { %v2537_v1 = vpop.f32.mrf.mxu1  ;;  %v2988_v19 = vpop.f32.mrf.mxu0 }
 0x1aa   :  { %v2644_v55 = vadd.f32 %v2537_v1, %v6723_v21  ;;  %v6819_v3 = vadd.f32 %v2988_v19, %v2640_v24 }
 0x1ab   :  { %v5084_v62 = vpop.f32.mrf.mxu1  ;;  %v5124_v42 = vpop.f32.mrf.mxu0 }
 0x1ac   :  { %v2647_v41 = vadd.f32 %v5084_v62, %v6726_v29  ;;  %v6822_v8 = vadd.f32 %v5124_v42, %v2643_v63 }
 0x1ad   :  { %v2540_v12 = vpop.f32.mrf.mxu1  ;;  %v2991_v13 = vpop.f32.mrf.mxu0 }
 0x1ae   :  { %v2645_v15 = vadd.f32 %v2540_v12, %v6729_v7  ;;  %v6825_v4 = vadd.f32 %v2991_v13, %v2641_v20 }
 0x1af   :  { %v5087_v39 = vpop.f32.mrf.mxu1  ;;  %v5127_v16 = vpop.f32.mrf.mxu0 }
 0x1b0   :  { %v2650_v6 = vadd.f32 %v5087_v39, %v6732_v59  ;;  %v6828_v28 = vadd.f32 %v5127_v16, %v2646_v49 }
 0x1b1   :  { %v2553_v21 = vpop.f32.mrf.mxu1  ;;  %v3004_v33 = vpop.f32.mrf.mxu0 }
 0x1b2   :  { %v2648_v58 = vadd.f32 %v2553_v21, %v6735_v46  ;;  %v6831_v30 = vadd.f32 %v3004_v33, %v2644_v55 }
 0x1b3   :  { %v5088_v29 = vpop.f32.mrf.mxu1  ;;  %v5128_v34 = vpop.f32.mrf.mxu0 }
 0x1b4   :  { %v2651_v2 = vadd.f32 %v5088_v29, %v6738_v31  ;;  %v6834_v32 = vadd.f32 %v5128_v34, %v2647_v41 }
 0x1b5   :  { %v2556_v7 = vpop.f32.mrf.mxu1  ;;  %v3007_v24 = vpop.f32.mrf.mxu0 }
 0x1b6   :  { %v2649_v51 = vadd.f32 %v2556_v7, %v6741_v53  ;;  %v6837_v44 = vadd.f32 %v3007_v24, %v2645_v15 }
 0x1b7   :  { %v5091_v59 = vpop.f32.mrf.mxu1  ;;  %v5131_v63 = vpop.f32.mrf.mxu0 }
 0x1b8   :  { %v2654_v14 = vadd.f32 %v5091_v59, %v6744_v57  ;;  %v6840_v11 = vadd.f32 %v5131_v63, %v2650_v6 }
 0x1b9   :  { %v2569_v46 = vpop.f32.mrf.mxu1  ;;  %v3020_v20 = vpop.f32.mrf.mxu0 }
 0x1ba   :  { %v2652_v45 = vadd.f32 %v2569_v46, %v6747_v61  ;;  %v6843_v52 = vadd.f32 %v3020_v20, %v2648_v58 }
 0x1bb   :  { %v5092_v31 = vpop.f32.mrf.mxu1  ;;  %v5132_v49 = vpop.f32.mrf.mxu0 }
 0x1bc   :  { %v2655_v1 = vadd.f32 %v5092_v31, %v6750_v25  ;;  %v6846_v19 = vadd.f32 %v5132_v49, %v2651_v2 }
 0x1bd   :  { %v2572_v53 = vpop.f32.mrf.mxu1  ;;  %v3023_v55 = vpop.f32.mrf.mxu0 }
 0x1be   :  { %v2653_v62 = vadd.f32 %v2572_v53, %v6753_v54  ;;  %v6849_v42 = vadd.f32 %v3023_v55, %v2649_v51 }
 0x1bf   :  { %v5095_v57 = vpop.f32.mrf.mxu1  ;;  %v5135_v41 = vpop.f32.mrf.mxu0 }
 0x1c0   :  { %v2658_v12 = vadd.f32 %v5095_v57, %v6756_v27  ;;  %v6852_v13 = vadd.f32 %v5135_v41, %v2654_v14 }
 0x1c1   :  { %v2585_v61 = vpop.f32.mrf.mxu1  ;;  %v3036_v15 = vpop.f32.mrf.mxu0 }
 0x1c2   :  { %v2656_v39 = vadd.f32 %v2585_v61, %v6759_v48  ;;  %v6855_v16 = vadd.f32 %v3036_v15, %v2652_v45 }
 0x1c3   :  { %v5096_v25 = vpop.f32.mrf.mxu1  ;;  %v5136_v6 = vpop.f32.mrf.mxu0 }
 0x1c4   :  { %v2659_v21 = vadd.f32 %v5096_v25, %v6762_v35  ;;  %v6858_v33 = vadd.f32 %v5136_v6, %v2655_v1 }
 0x1c5   :  { %v2588_v54 = vpop.f32.mrf.mxu1  ;;  %v3039_v58 = vpop.f32.mrf.mxu0 }
 0x1c6   :  { %v2657_v29 = vadd.f32 %v2588_v54, %v6765_v5  ;;  %v6861_v34 = vadd.f32 %v3039_v58, %v2653_v62 }
 0x1c7   :  { %v5099_v27 = vpop.f32.mrf.mxu1  ;;  %v5139_v2 = vpop.f32.mrf.mxu0 }
 0x1c8   :  { %v2662_v7 = vadd.f32 %v5099_v27, %v6768_v36  ;;  %v6864_v24 = vadd.f32 %v5139_v2, %v2658_v12 }
 0x1c9   :  { %v2601_v48 = vpop.f32.mrf.mxu1  ;;  %v3052_v51 = vpop.f32.mrf.mxu0 }
 0x1ca   :  { %v2660_v59 = vadd.f32 %v2601_v48, %v6771_v26  ;;  %v6867_v63 = vadd.f32 %v3052_v51, %v2656_v39 }
 0x1cb   :  { %v5100_v35 = vpop.f32.mrf.mxu1  ;;  %v5140_v14 = vpop.f32.mrf.mxu0 }
 0x1cc   :  { %v2663_v46 = vadd.f32 %v5100_v35, %v6774_v47  ;;  %v6870_v20 = vadd.f32 %v5140_v14, %v2659_v21 }
 0x1cd   :  { %v2604_v5 = vpop.f32.mrf.mxu1  ;;  %v3055_v45 = vpop.f32.mrf.mxu0 }
 0x1ce   :  { %v2661_v31 = vadd.f32 %v2604_v5, %v6777_v23  ;;  %v6873_v49 = vadd.f32 %v3055_v45, %v2657_v29 }
 0x1cf   :  { %v5103_v36 = vpop.f32.mrf.mxu1  ;;  %v5143_v1 = vpop.f32.mrf.mxu0 }
 0x1d0   :  { %v2666_v53 = vadd.f32 %v5103_v36, %v6779_v56  ;;  %v6876_v55 = vadd.f32 %v5143_v1, %v2662_v7 }
 0x1d1   :  { %v2617_v26 = vpop.f32.mrf.mxu1  ;;  %v3068_v62 = vpop.f32.mrf.mxu0 }
 0x1d2   :  { %v2664_v57 = vadd.f32 %v2617_v26, %v6782_v18  ;;  %v6879_v41 = vadd.f32 %v3068_v62, %v2660_v59 }
 0x1d3   :  { %v5104_v47 = vpop.f32.mrf.mxu1  ;;  %v5144_v12 = vpop.f32.mrf.mxu0 }
 0x1d4   :  { %v2667_v61 = vadd.f32 %v5104_v47, %v6785_v0  ;;  %v6882_v15 = vadd.f32 %v5144_v12, %v2663_v46 }
 0x1d5   :  { %v2620_v23 = vpop.f32.mrf.mxu1  ;;  %v3071_v39 = vpop.f32.mrf.mxu0 }
 0x1d6   :  { %v2665_v25 = vadd.f32 %v2620_v23, %v6788_v38  ;;  %v6885_v6 = vadd.f32 %v3071_v39, %v2661_v31 }
 0x1d7   :  { %v5147_v56 = vpop.f32.mrf.mxu0  ;;  %v5159_v21 = vpop.f32.mrf.mxu1 }
 0x1d8   :  { %v6887_v54 = vadd.f32 %v5147_v56, %v2666_v53  ;;  %v3576_v35 = vadd.f32 %v5159_v21, %v6792_v60 }
 0x1d9   :  { %v3084_v58 = vpop.f32.mrf.mxu0  ;;  %v3431_v18 = vpop.f32.mrf.mxu1 }
 0x1da   :  { %v6889_v29 = vadd.f32 %v3084_v58, %v2664_v57  ;;  %v3574_v5 = vadd.f32 %v3431_v18, %v6795_v40 }
 0x1db   :  { %v5148_v27 = vpop.f32.mrf.mxu0  ;;  %v5160_v2 = vpop.f32.mrf.mxu1 }
 0x1dc   :  { %v6891_v7 = vadd.f32 %v5148_v27, %v2667_v61  ;;  %v3577_v45 = vadd.f32 %v5160_v2, %v6798_v37 }
 0x1dd   :  { %v3087_v0 = vpop.f32.mrf.mxu0  ;;  %v3434_v48 = vpop.f32.mrf.mxu1 }
 0x1de   :  { %v6893_v51 = vadd.f32 %v3087_v0, %v2665_v25  ;;  %v3575_v53 = vadd.f32 %v3434_v48, %v6801_v9 }
 0x1df   :  { %v5163_v59 = vpop.f32.mrf.mxu1  ;;  %v5203_v38 = vpop.f32.mrf.mxu0 }
 0x1e0   :  { %v3918_v31 = vadd.f32 %v5203_v38, %v3576_v35  ;;  %v3580_v25 = vadd.f32 %v5163_v59, %v6804_v43 }
 0x1e1   :  { %v3447_v14 = vpop.f32.mrf.mxu1  ;;  %v3773_v46 = vpop.f32.mrf.mxu0 }
 0x1e2   :  { %v3916_v26 = vadd.f32 %v3773_v46, %v3574_v5  ;;  %v3954_v12 = vmax.f32 %v3918_v31, 0.0  ;;  %v3578_v18 = vadd.f32 %v3447_v14, %v6807_v22 }
 0x1e3   :  { %v5164_v36 = vpop.f32.mrf.mxu1  ;;  %v5204_v1 = vpop.f32.mrf.mxu0 }
 0x1e4   :  { %v3919_v62 = vadd.f32 %v5204_v1, %v3577_v45  ;;  %v3952_v56 = vmax.f32 %v3916_v26, 0.0  ;;  %v3581_v9 = vadd.f32 %v5164_v36, %v6810_v10 }
 0x1e5   :  { %v3450_v57 = vpop.f32.mrf.mxu1  ;;  %v3776_v47 = vpop.f32.mrf.mxu0 }
 0x1e6   :  { %v3955_v61 = vmax.f32 %v3919_v62, 0.0  ;;  %v3917_v23 = vadd.f32 %v3776_v47, %v3575_v53  ;;  %v3579_v38 = vadd.f32 %v3450_v57, %v6813_v17 }
 0x1e7   :  { %v5167_v39 = vpop.f32.mrf.mxu1  ;;  %v5207_v60 = vpop.f32.mrf.mxu0 }
 0x1e8   :  { %v4544_v40 = vpack.c.bf16 %v3955_v61, %v3954_v12  ;;  %v3953_v21 = vmax.f32 %v3917_v23, 0.0  ;;  %v3922_v2 = vadd.f32 %v5207_v60, %v3580_v25  ;;  %v3584_v22 = vadd.f32 %v5167_v39, %v6816_v50 }
 0x1e9   :  { %v3463_v37 = vpop.f32.mrf.mxu1  ;;  %v3789_v58 = vpop.f32.mrf.mxu0 }
 0x1ea   :  { %4626 = vst [vmem:[#allocation5 + $0x8] sm:$0xff] %v4544_v40   ;;  %v4539_v27 = vpack.c.bf16 %v3953_v21, %v3952_v56  ;;  %v3920_v35 = vadd.f32 %v3789_v58, %v3578_v18  ;;  %v3958_v5 = vmax.f32 %v3922_v2, 0.0  ;;  %v3582_v47 = vadd.f32 %v3463_v37, %v6819_v3 }
 0x1eb   :  { %v5168_v0 = vpop.f32.mrf.mxu1  ;;  %v5208_v48 = vpop.f32.mrf.mxu0 }
 0x1ec   :  { %4540 = vst [vmem:[#allocation5] sm:$0xff] %v4539_v27   ;;  %v3923_v46 = vadd.f32 %v5208_v48, %v3581_v9  ;;  %v3956_v10 = vmax.f32 %v3920_v35, 0.0  ;;  %v3585_v17 = vadd.f32 %v5168_v0, %v6822_v8 }
 0x1ed   :  { %v3466_v43 = vpop.f32.mrf.mxu1  ;;  %v3792_v59 = vpop.f32.mrf.mxu0 }
 0x1ee   :  { %v3959_v45 = vmax.f32 %v3923_v46, 0.0  ;;  %v3921_v31 = vadd.f32 %v3792_v59, %v3579_v38  ;;  %v3583_v60 = vadd.f32 %v3466_v43, %v6825_v4 }
 0x1ef   :  { %v5171_v1 = vpop.f32.mrf.mxu1  ;;  %v5211_v53 = vpop.f32.mrf.mxu0 }
 0x1f0   :  { %v4554_v14 = vpack.c.bf16 %v3959_v45, %v3958_v5  ;;  %v3957_v36 = vmax.f32 %v3921_v31, 0.0  ;;  %v3926_v12 = vadd.f32 %v5211_v53, %v3584_v22  ;;  %v3588_v3 = vadd.f32 %v5171_v1, %v6828_v28 }
 0x1f1   :  { %v3479_v26 = vpop.f32.mrf.mxu1  ;;  %v3805_v62 = vpop.f32.mrf.mxu0 }
 0x1f2   :  { %4628 = vst [vmem:[#allocation5 + $0x18] sm:$0xff] %v4554_v14   ;;  %v4549_v57 = vpack.c.bf16 %v3957_v36, %v3956_v10  ;;  %v3924_v25 = vadd.f32 %v3805_v62, %v3582_v47  ;;  %v3962_v40 = vmax.f32 %v3926_v12, 0.0  ;;  %v3586_v48 = vadd.f32 %v3479_v26, %v6831_v30 }
 0x1f3   :  { %v5172_v61 = vpop.f32.mrf.mxu1  ;;  %v5212_v23 = vpop.f32.mrf.mxu0 }
 0x1f4   :  { %4627 = vst [vmem:[#allocation5 + $0x10] sm:$0xff] %v4549_v57   ;;  %v3927_v56 = vadd.f32 %v5212_v23, %v3585_v17  ;;  %v3960_v8 = vmax.f32 %v3924_v25, 0.0  ;;  %v3589_v4 = vadd.f32 %v5172_v61, %v6834_v32 }
 0x1f5   :  { %v3482_v50 = vpop.f32.mrf.mxu1  ;;  %v3808_v39 = vpop.f32.mrf.mxu0 }
 0x1f6   :  { %v3963_v21 = vmax.f32 %v3927_v56, 0.0  ;;  %v3925_v58 = vadd.f32 %v3808_v39, %v3583_v60  ;;  %v3587_v59 = vadd.f32 %v3482_v50, %v6837_v44 }
 0x1f7   :  { %v5175_v18 = vpop.f32.mrf.mxu1  ;;  %v5215_v9 = vpop.f32.mrf.mxu0 }
 0x1f8   :  { %v4564_v37 = vpack.c.bf16 %v3963_v21, %v3962_v40  ;;  %v3961_v27 = vmax.f32 %v3925_v58, 0.0  ;;  %v3930_v35 = vadd.f32 %v5215_v9, %v3588_v3  ;;  %v3592_v30 = vadd.f32 %v5175_v18, %v6840_v11 }
 0x1f9   :  { %v3495_v2 = vpop.f32.mrf.mxu1  ;;  %v3821_v0 = vpop.f32.mrf.mxu0 }
 0x1fa   :  { %4630 = vst [vmem:[#allocation5 + $0x28] sm:$0xff] %v4564_v37   ;;  %v4559_v38 = vpack.c.bf16 %v3961_v27, %v3960_v8  ;;  %v3928_v5 = vadd.f32 %v3821_v0, %v3586_v48  ;;  %v3966_v1 = vmax.f32 %v3930_v35, 0.0  ;;  %v3590_v17 = vadd.f32 %v3495_v2, %v6843_v52 }
 0x1fb   :  { %v5176_v46 = vpop.f32.mrf.mxu1  ;;  %v5216_v43 = vpop.f32.mrf.mxu0 }
 0x1fc   :  { %4629 = vst [vmem:[#allocation5 + $0x20] sm:$0xff] %v4559_v38   ;;  %v3931_v45 = vadd.f32 %v5216_v43, %v3589_v4  ;;  %v3964_v32 = vmax.f32 %v3928_v5, 0.0  ;;  %v3593_v44 = vadd.f32 %v5176_v46, %v6846_v19 }
 0x1fd   :  { %v3498_v28 = vpop.f32.mrf.mxu1  ;;  %v3824_v31 = vpop.f32.mrf.mxu0 }
 0x1fe   :  { %v3967_v53 = vmax.f32 %v3931_v45, 0.0  ;;  %v3929_v22 = vadd.f32 %v3824_v31, %v3587_v59  ;;  %v3591_v60 = vadd.f32 %v3498_v28, %v6849_v42 }
 0x1ff   :  { %v5179_v10 = vpop.f32.mrf.mxu1  ;;  %v5219_v14 = vpop.f32.mrf.mxu0 }
 0x200   :  { %v4574_v36 = vpack.c.bf16 %v3967_v53, %v3966_v1  ;;  %v3965_v26 = vmax.f32 %v3929_v22, 0.0  ;;  %v3934_v12 = vadd.f32 %v5219_v14, %v3592_v30  ;;  %v3596_v52 = vadd.f32 %v5179_v10, %v6852_v13 }
 0x201   :  { %v3511_v62 = vpop.f32.mrf.mxu1  ;;  %v3837_v47 = vpop.f32.mrf.mxu0 }
 0x202   :  { %4632 = vst [vmem:[#allocation5 + $0x38] sm:$0xff] %v4574_v36   ;;  %v4569_v57 = vpack.c.bf16 %v3965_v26, %v3964_v32  ;;  %v3932_v25 = vadd.f32 %v3837_v47, %v3590_v17  ;;  %v3970_v39 = vmax.f32 %v3934_v12, 0.0  ;;  %v3594_v27 = vadd.f32 %v3511_v62, %v6855_v16 }
 0x203   :  { %v5180_v61 = vpop.f32.mrf.mxu1  ;;  %v5220_v23 = vpop.f32.mrf.mxu0 }
 0x204   :  { %4631 = vst [vmem:[#allocation5 + $0x30] sm:$0xff] %v4569_v57   ;;  %v3935_v56 = vadd.f32 %v5220_v23, %v3593_v44  ;;  %v3968_v19 = vmax.f32 %v3932_v25, 0.0  ;;  %v3597_v42 = vadd.f32 %v5180_v61, %v6858_v33 }
 0x205   :  { %v3514_v11 = vpop.f32.mrf.mxu1  ;;  %v3840_v50 = vpop.f32.mrf.mxu0 }
 0x206   :  { %v3971_v40 = vmax.f32 %v3935_v56, 0.0  ;;  %v3933_v21 = vadd.f32 %v3840_v50, %v3591_v60  ;;  %v3595_v38 = vadd.f32 %v3514_v11, %v6861_v34 }
 0x207   :  { %v5183_v58 = vpop.f32.mrf.mxu1  ;;  %v5223_v18 = vpop.f32.mrf.mxu0 }
 0x208   :  { %v4584_v9 = vpack.c.bf16 %v3971_v40, %v3970_v39  ;;  %v3969_v3 = vmax.f32 %v3933_v21, 0.0  ;;  %v3938_v0 = vadd.f32 %v5223_v18, %v3596_v52  ;;  %v3600_v16 = vadd.f32 %v5183_v58, %v6864_v24 }
 0x209   :  { %v3527_v8 = vpop.f32.mrf.mxu1  ;;  %v3853_v37 = vpop.f32.mrf.mxu0 }
 0x20a   :  { %4634 = vst [vmem:[#allocation5 + $0x48] sm:$0xff] %v4584_v9   ;;  %v4579_v2 = vpack.c.bf16 %v3969_v3, %v3968_v19  ;;  %v3936_v35 = vadd.f32 %v3853_v37, %v3594_v27  ;;  %v3974_v59 = vmax.f32 %v3938_v0, 0.0  ;;  %v3598_v14 = vadd.f32 %v3527_v8, %v6867_v63 }
 0x20b   :  { %v5184_v48 = vpop.f32.mrf.mxu1  ;;  %v5224_v4 = vpop.f32.mrf.mxu0 }
 0x20c   :  { %4633 = vst [vmem:[#allocation5 + $0x40] sm:$0xff] %v4579_v2   ;;  %v3939_v46 = vadd.f32 %v5224_v4, %v3597_v42  ;;  %v3972_v33 = vmax.f32 %v3936_v35, 0.0  ;;  %v3601_v34 = vadd.f32 %v5184_v48, %v6870_v20 }
 0x20d   :  { %v3530_v13 = vpop.f32.mrf.mxu1  ;;  %v3856_v43 = vpop.f32.mrf.mxu0 }
 0x20e   :  { %v3975_v5 = vmax.f32 %v3939_v46, 0.0  ;;  %v3937_v45 = vadd.f32 %v3856_v43, %v3595_v38  ;;  %v3599_v62 = vadd.f32 %v3530_v13, %v6873_v49 }
 0x20f   :  { %v5187_v28 = vpop.f32.mrf.mxu1  ;;  %v5227_v31 = vpop.f32.mrf.mxu0 }
 0x210   :  { %v4594_v1 = vpack.c.bf16 %v3975_v5, %v3974_v59  ;;  %v3973_v53 = vmax.f32 %v3937_v45, 0.0  ;;  %v3942_v32 = vadd.f32 %v5227_v31, %v3600_v16  ;;  %v3604_v63 = vadd.f32 %v5187_v28, %v6876_v55 }
 0x211   :  { %v3543_v22 = vpop.f32.mrf.mxu1  ;;  %v3869_v10 = vpop.f32.mrf.mxu0 }
 0x212   :  { %4636 = vst [vmem:[#allocation5 + $0x58] sm:$0xff] %v4594_v1   ;;  %v4589_v30 = vpack.c.bf16 %v3973_v53, %v3972_v33  ;;  %v3940_v47 = vadd.f32 %v3869_v10, %v3598_v14  ;;  %v3978_v57 = vmax.f32 %v3942_v32, 0.0  ;;  %v3602_v39 = vadd.f32 %v3543_v22, %v6879_v41 }
 0x213   :  { %v5188_v36 = vpop.f32.mrf.mxu1  ;;  %v5228_v26 = vpop.f32.mrf.mxu0 }
 0x214   :  { %4635 = vst [vmem:[#allocation5 + $0x50] sm:$0xff] %v4589_v30   ;;  %v3943_v17 = vadd.f32 %v5228_v26, %v3601_v34  ;;  %v3976_v20 = vmax.f32 %v3940_v47, 0.0  ;;  %v3605_v49 = vadd.f32 %v5188_v36, %v6882_v15 }
 0x215   :  { %v3546_v24 = vpop.f32.mrf.mxu1  ;;  %v3872_v44 = vpop.f32.mrf.mxu0 }
 0x216   :  { %v3979_v12 = vmax.f32 %v3943_v17, 0.0  ;;  %v3941_v61 = vadd.f32 %v3872_v44, %v3599_v62  ;;  %v3603_v18 = vadd.f32 %v3546_v24, %v6885_v6 }
 0x217   :  { %v5191_v23 = vpop.f32.mrf.mxu1  ;;  %v5231_v60 = vpop.f32.mrf.mxu0 }
 0x218   :  { %v4604_v25 = vpack.c.bf16 %v3979_v12, %v3978_v57  ;;  %v3977_v56 = vmax.f32 %v3941_v61, 0.0  ;;  %v3946_v21 = vadd.f32 %v5231_v60, %v3604_v63  ;;  %v3608_v42 = vadd.f32 %v5191_v23, %v6887_v54 }
 0x219   :  { %v3559_v11 = vpop.f32.mrf.mxu1  ;;  %v3885_v50 = vpop.f32.mrf.mxu0 }
 0x21a   :  { %4638 = vst [vmem:[#allocation5 + $0x68] sm:$0xff] %v4604_v25   ;;  %v4599_v40 = vpack.c.bf16 %v3977_v56, %v3976_v20  ;;  %v3944_v52 = vadd.f32 %v3885_v50, %v3602_v39  ;;  %v3982_v3 = vmax.f32 %v3946_v21, 0.0  ;;  %v3606_v4 = vadd.f32 %v3559_v11, %v6889_v29 }
 0x21b   :  { %v5232_v58 = vpop.f32.mrf.mxu0  ;;  %v5192_v9 = vpop.f32.mrf.mxu1 }
 0x21c   :  { %4637 = vst [vmem:[#allocation5 + $0x60] sm:$0xff] %v4599_v40   ;;  %v3947_v19 = vadd.f32 %v5232_v58, %v3605_v49  ;;  %v3980_v41 = vmax.f32 %v3944_v52, 0.0  ;;  %v3609_v6 = vadd.f32 %v5192_v9, %v6891_v7 }
 0x21d   :  { %v3888_v55 = vpop.f32.mrf.mxu0  ;;  %v3562_v0 = vpop.f32.mrf.mxu1 }
 0x21e   :  { %v3983_v8 = vmax.f32 %v3947_v19, 0.0  ;;  %v3945_v37 = vadd.f32 %v3888_v55, %v3603_v18  ;;  %v3607_v13 = vadd.f32 %v3562_v0, %v6893_v51 }
 0x21f   :  { %v5235_v27 = vpop.f32.mrf.mxu0 }
 0x220   :  { %v4614_v2 = vpack.c.bf16 %v3983_v8, %v3982_v3  ;;  %v3981_v15 = vmax.f32 %v3945_v37, 0.0  ;;  %v3950_v35 = vadd.f32 %v5235_v27, %v3608_v42 }
 0x221   :  { %v3901_v48 = vpop.f32.mrf.mxu0 }
 0x222   :  { %4640 = vst [vmem:[#allocation5 + $0x78] sm:$0xff] %v4614_v2   ;;  %v4609_v38 = vpack.c.bf16 %v3981_v15, %v3980_v41  ;;  %v3948_v43 = vadd.f32 %v3901_v48, %v3606_v4  ;;  %v3986_v54 = vmax.f32 %v3950_v35, 0.0 }
 0x223   :  { %v5236_v46 = vpop.f32.mrf.mxu0 }
 0x224   :  { %4639 = vst [vmem:[#allocation5 + $0x70] sm:$0xff] %v4609_v38   ;;  %v3951_v59 = vadd.f32 %v5236_v46, %v3609_v6  ;;  %v3984_v31 = vmax.f32 %v3948_v43, 0.0 }
 0x225   :  { %v3904_v5 = vpop.f32.mrf.mxu0 }
 0x226   :  { %v3987_v45 = vmax.f32 %v3951_v59, 0.0  ;;  %v3949_v28 = vadd.f32 %v3904_v5, %v3607_v13 }
 0x228   :  { %v4624_v16 = vpack.c.bf16 %v3987_v45, %v3986_v54  ;;  %v3985_v29 = vmax.f32 %v3949_v28, 0.0 }
 0x22a   :  { %4642 = vst [vmem:[#allocation5 + $0x88] sm:$0xff] %v4624_v16   ;;  %v4619_v7 = vpack.c.bf16 %v3985_v29, %v3984_v31 }
 0x22c   :  { %4641 = vst [vmem:[#allocation5 + $0x80] sm:$0xff] %v4619_v7  }
 0x22d   :  { %5396 = shalt.err (!%p5393_p9)
}
 0x22e   :  { %4179 = dma.vmem_to_hbm [thread:$0]  %s4174_s29, 2304, %s6940_s3, [#allocation4], %s5410_s15, %s5410_s15, %s5411_s16  }
 0x22f   :  { %5407 = dma.done.wait [#allocation4], 2304  }
 0x230   :  { %5408 = vsyncadd [#allocation4], 4294964992 }
 0x231   :  { %4183 = vsyncpa [#allocation3], 1 }
 0x232   :  { %4184 = vsyncpa [#allocation4], 1 }

</bundles_post_ra>
